<compile_context>
chip_gen: v7x
topology: tpu7x:2x2x1
jax: 0.10.0
libtpu: 0.0.40
codegen_flags: <defaults>
</compile_context>

<pallas_src>
import functools
import math

import jax
import jax.numpy as jnp
from jax import lax
from jax.experimental import pallas as pl
from jax.experimental.pallas import tpu as pltpu


# bf16 halves the dominant FFN weight DMA (kernel is weight-DMA / latency
# bound) while keeping f32 accumulation; set to jnp.float32 for strict parity
# with the fp32 PyTorch reference (~1e-3 relative difference otherwise).
_FFN_WEIGHT_DTYPE = jnp.bfloat16


# ----------------------------- kernel helpers -------------------------------

def _layer_norm(x, gamma, beta, eps=1e-5):
    mu = jnp.mean(x, axis=-1, keepdims=True)
    xc = x - mu
    var = jnp.mean(xc * xc, axis=-1, keepdims=True)
    return xc * lax.rsqrt(var + eps) * gamma + beta


def _softmax_lastdim(s):
    s = s - jnp.max(s, axis=-1, keepdims=True)
    p = jnp.exp(s)
    return p / jnp.sum(p, axis=-1, keepdims=True)      # exact divide (fidelity)


def _split_heads(x2d, num_heads):
    """(rows, E) -> (H, rows, D): one reshape + one transpose per tensor."""
    rows, e = x2d.shape
    d = e // num_heads
    return jnp.transpose(x2d.reshape(rows, num_heads, d), (1, 0, 2))


def _mha(q_src, kv_src, w, bq, bk, bv, bo, num_heads, self_attn):
    """Multi-head attention.  w is lane-dense (E, 4E) packed as [Wo|Wq|Wk|Wv].

    q/k/v come from one full-width projection per source (slices of the result,
    not of the weight); Wo is a prefix (lane-0) slice of the slab.  Score and
    AV matmuls are batched over the head axis.
    """
    E = q_src.shape[-1]
    D = E // num_heads
    scale = 1.0 / math.sqrt(D)

    proj_q = jnp.dot(q_src, w, preferred_element_type=jnp.float32)     # (Sq, 4E)
    if self_attn:
        proj_kv = proj_q
    else:
        proj_kv = jnp.dot(kv_src, w, preferred_element_type=jnp.float32)  # (Skv, 4E)

    q = proj_q[:, E:2 * E] + bq
    k = proj_kv[:, 2 * E:3 * E] + bk
    v = proj_kv[:, 3 * E:4 * E] + bv

    qh = _split_heads(q, num_heads) * scale            # (H, Sq, D)
    kh = _split_heads(k, num_heads)                    # (H, Skv, D)
    vh = _split_heads(v, num_heads)                    # (H, Skv, D)

    s = jnp.einsum("hqd,hkd->hqk", qh, kh, preferred_element_type=jnp.float32)
    p = _softmax_lastdim(s)
    oh = jnp.einsum("hqk,hkd->hqd", p, vh, preferred_element_type=jnp.float32)

    o = jnp.transpose(oh, (1, 0, 2)).reshape(q_src.shape[0], E)        # (Sq, E)
    return jnp.dot(o, w[:, 0:E], preferred_element_type=jnp.float32) + bo


# Row layout of the packed (15, E) small-parameter slab (per layer):
#  0: sa_bq  1: sa_bk  2: sa_bv  3: sa_bo
#  4: ca_bq  5: ca_bk  6: ca_bv  7: ca_bo
#  8: l2b
#  9: n1g  10: n1b  11: n2g  12: n2b  13: n3g  14: n3b


def _fused_decoder_kernel(num_heads,
                          x_ref, mem_ref, w_attn_ref, l1w_ref, l1b_ref,
                          l2w_ref, small_ref, o_ref, x_scr):
    layer = pl.program_id(0)

    @pl.when(layer == 0)
    def _():
        x_scr[...] = x_ref[...].astype(jnp.float32)

    x = x_scr[...]
    mem = mem_ref[...].astype(jnp.float32)
    small = small_ref[...]                               # one load, ~2 vregs

    def row(i):
        return small[i:i + 1, :]                         # (1, E)

    sa_bq, sa_bk, sa_bv, sa_bo = row(0), row(1), row(2), row(3)
    ca_bq, ca_bk, ca_bv, ca_bo = row(4), row(5), row(6), row(7)
    l2b = row(8)
    n1g, n1b = row(9), row(10)
    n2g, n2b = row(11), row(12)
    n3g, n3b = row(13), row(14)

    # --- self attention block (post-norm; dropout is identity in eval) ---
    sa = _mha(x, x, w_attn_ref[0], sa_bq, sa_bk, sa_bv, sa_bo,
              num_heads, self_attn=True)
    x = _layer_norm(x + sa, n1g, n1b)

    # --- cross attention against the memory (Fenv) ---
    ca = _mha(x, mem, w_attn_ref[1], ca_bq, ca_bk, ca_bv, ca_bo,
              num_heads, self_attn=False)
    x = _layer_norm(x + ca, n2g, n2b)

    # --- feed-forward (ReLU, nn.TransformerDecoderLayer default) ---
    w1 = l1w_ref[...]                                    # (E, FF), lane-dense
    h = jnp.dot(x.astype(w1.dtype), w1,
                preferred_element_type=jnp.float32) + l1b_ref[...]
    h = jnp.maximum(h, 0.0)
    w2 = l2w_ref[...]                                    # (E, FF): y = h @ W2^T
    ff = lax.dot_general(h.astype(w2.dtype), w2,
                         dimension_numbers=(((1,), (1,)), ((), ())),
                         preferred_element_type=jnp.float32) + l2b
    x = _layer_norm(x + ff, n3g, n3b)

    x_scr[...] = x

    @pl.when(layer == pl.num_programs(0) - 1)
    def _():
        o_ref[...] = x.astype(o_ref.dtype)
    # TODO(synk): dropout(p=0.1) of TransformerDecoderLayer is train-only; eval
    # semantics (identity) are implemented here.


# ------------------------------ glue / packing ------------------------------

def pack_params(layer_params):
    """Stack per-layer dicts into 5 lane-dense slabs with a leading layer axis."""
    w_attn = jnp.stack([
        jnp.stack([
            jnp.concatenate([p["sa_wo"], p["sa_wq"], p["sa_wk"], p["sa_wv"]], axis=1),
            jnp.concatenate([p["ca_wo"], p["ca_wq"], p["ca_wk"], p["ca_wv"]], axis=1),
        ], axis=0)
        for p in layer_params], axis=0)                                # (L, 2, E, 4E)
    l1w = jnp.stack([p["l1w"] for p in layer_params],
                    axis=0).astype(_FFN_WEIGHT_DTYPE)                 # (L, E, FF)
    l1b = jnp.stack([p["l1b"] for p in layer_params], axis=0)          # (L, 1, FF)
    l2w = jnp.stack([p["l2w"] for p in layer_params],
                    axis=0).astype(_FFN_WEIGHT_DTYPE)                 # (L, E, FF) lane-dense
    small = jnp.stack([
        jnp.concatenate([
            p["sa_bq"], p["sa_bk"], p["sa_bv"], p["sa_bo"],
            p["ca_bq"], p["ca_bk"], p["ca_bv"], p["ca_bo"],
            p["l2b"],
            p["n1g"], p["n1b"], p["n2g"], p["n2b"], p["n3g"], p["n3b"],
        ], axis=0)
        for p in layer_params], axis=0)                                # (L, 15, E)
    return w_attn, l1w, l1b, l2w, small


def trajectory_decoder_forward(V_prime_k, Fenv, layer_params, num_heads):
    """V_prime_k: (S, B, E) query; Fenv: (M, E) -> unsqueeze(1) -> (M, 1, E)."""
    S, B, E = V_prime_k.shape
    assert B == 1, "Fenv.unsqueeze(1) in the reference forces memory batch == 1"
    assert E % num_heads == 0
    x = V_prime_k[:, 0, :]          # squeeze batch for the 2D kernel
    mem = Fenv                      # (M, E); batch(=1) dim handled in glue
    M = mem.shape[0]
    L = len(layer_params)

    w_attn, l1w, l1b, l2w, small = pack_params(layer_params)
    FF = l1w.shape[-1]

    # advisory cost estimate for the surrounding XLA schedule
    flops_per_layer = (
        2 * S * E * 4 * E                 # self fused projection
        + 2 * S * S * E * 2               # self scores + AV (all heads)
        + 2 * S * E * E                   # self out-proj
        + 2 * (S + M) * E * 4 * E         # cross q / kv projections
        + 2 * S * M * E * 2               # cross scores + AV
        + 2 * S * E * E                   # cross out-proj
        + 4 * S * E * FF                  # FFN
    )
    param_bytes = sum(int(a.size) * a.dtype.itemsize
                      for a in (w_attn, l1w, l1b, l2w, small))
    cost = pl.CostEstimate(
        flops=int(L * flops_per_layer),
        transcendentals=int(L * num_heads * (S * S + S * M)),
        bytes_accessed=int(param_bytes + (2 * x.size + mem.size) * 4),
    )

    out = pl.pallas_call(
        functools.partial(_fused_decoder_kernel, num_heads),
        out_shape=jax.ShapeDtypeStruct((S, E), x.dtype),
        grid_spec=pltpu.PrefetchScalarGridSpec(
            num_scalar_prefetch=0,
            grid=(L,),
            in_specs=[
                pl.BlockSpec((S, E), lambda l: (0, 0)),                     # x (resident)
                pl.BlockSpec((M, E), lambda l: (0, 0)),                     # mem (resident)
                pl.BlockSpec((None, 2, E, 4 * E), lambda l: (l, 0, 0, 0)),  # [Wo|Wq|Wk|Wv]
                pl.BlockSpec((None, E, FF), lambda l: (l, 0, 0)),           # l1w
                pl.BlockSpec((None, 1, FF), lambda l: (l, 0, 0)),           # l1b
                pl.BlockSpec((None, E, FF), lambda l: (l, 0, 0)),           # l2w (lane-dense)
                pl.BlockSpec((None, 15, E), lambda l: (l, 0, 0)),           # small params
            ],
            out_specs=pl.BlockSpec((S, E), lambda l: (0, 0)),
            scratch_shapes=[pltpu.VMEM((S, E), jnp.float32)],       # carried activation
        ),
        compiler_params=pltpu.CompilerParams(
            dimension_semantics=("arbitrary",),      # layers are sequential
            vmem_limit_bytes=32 * 1024 * 1024,       # portable across v5e/v6e/v7x
        ),
        cost_estimate=cost,
    )(x, mem, w_attn, l1w, l1b, l2w, small)

    return out[:, None, :]          # restore (S, B=1, E)


# ------------------------------- init / main --------------------------------

def init_layer_params(key, E, FF):
    ks = jax.random.split(key, 16)
    std = 0.02

    def w(k, shape):
        return std * jax.random.normal(k, shape, jnp.float32)

    p = {}
    # self-attention in_proj (split into q/k/v, stored pre-transposed) + out_proj
    p["sa_wq"], p["sa_wk"], p["sa_wv"] = w(ks[0], (E, E)), w(ks[1], (E, E)), w(ks[2], (E, E))
    p["sa_wo"] = w(ks[3], (E, E))
    p["sa_bq"], p["sa_bk"], p["sa_bv"] = w(ks[4], (1, E)), w(ks[5], (1, E)), w(ks[6], (1, E))
    p["sa_bo"] = w(ks[7], (1, E))
    # cross-attention
    p["ca_wq"], p["ca_wk"], p["ca_wv"] = w(ks[8], (E, E)), w(ks[9], (E, E)), w(ks[10], (E, E))
    p["ca_wo"] = w(ks[11], (E, E))
    p["ca_bq"], p["ca_bk"], p["ca_bv"] = w(ks[12], (1, E)), w(ks[13], (1, E)), w(ks[14], (1, E))
    p["ca_bo"] = jnp.zeros((1, E), jnp.float32)
    # feed-forward: linear1 stored (in, out) = (E, FF); linear2 kept in PyTorch
    # (out, in) = (E, FF) layout (lane-dense), contracted on its last dim.
    kf1, kf2 = jax.random.split(ks[15], 2)
    p["l1w"], p["l1b"] = w(kf1, (E, FF)), jnp.zeros((1, FF), jnp.float32)
    p["l2w"], p["l2b"] = w(kf2, (E, FF)), jnp.zeros((1, E), jnp.float32)
    # layer norms
    for n in ("n1", "n2", "n3"):
        p[n + "g"] = jnp.ones((1, E), jnp.float32)
        p[n + "b"] = jnp.zeros((1, E), jnp.float32)
    return p


if __name__ == "__main__":
    S, B, E, M = 8, 1, 32, 16          # seq_len, batch(=1), embed_dim, memory len
    num_heads, num_layers = 4, 2
    FF = 2048                          # nn.TransformerDecoderLayer default dim_feedforward

    key = jax.random.PRNGKey(0)
    k_in, k_mem, k_p = jax.random.split(key, 3)
    V_prime_k = jax.random.normal(k_in, (S, B, E), jnp.float32)
    Fenv = jax.random.normal(k_mem, (M, E), jnp.float32)   # (M, E); unsqueeze handled in glue

    layer_keys = jax.random.split(k_p, num_layers)
    layer_params = [init_layer_params(k, E, FF) for k in layer_keys]

    out = trajectory_decoder_forward(V_prime_k, Fenv, layer_params, num_heads)
    out = jax.block_until_ready(out)
    assert out.shape == (S, B, E)
    assert jnp.all(jnp.isfinite(out))
    print("KERNEL_OK")
</pallas_src>

<mosaic_0001>
module attributes {stable_mosaic.version = 11 : i64} {
  func.func @_fused_decoder_kernel(%arg0: i32, %arg1: memref<8x32xf32, #tpu.memory_space<vmem>>, %arg2: memref<16x32xf32, #tpu.memory_space<vmem>>, %arg3: memref<1x2x32x128xf32, #tpu.memory_space<vmem>>, %arg4: memref<1x32x2048xbf16, #tpu.memory_space<vmem>>, %arg5: memref<1x1x2048xf32, #tpu.memory_space<vmem>>, %arg6: memref<1x32x2048xbf16, #tpu.memory_space<vmem>>, %arg7: memref<1x15x32xf32, #tpu.memory_space<vmem>>, %arg8: memref<8x32xf32, #tpu.memory_space<vmem>>, %arg9: memref<8x32xf32, #tpu.memory_space<vmem>>) attributes {dimension_semantics = [#tpu.dimension_semantics<arbitrary>], iteration_bounds = array<i64: 2>, scalar_prefetch = 0 : i64, scratch_operands = 1 : i64, tpu.core_type = #tpu.core_type<tc>, window_params = [{pipeline_mode = #tpu.pipeline_mode<synchronous>, transform_indices = @transform_0, window_bounds = array<i64: 8, 32>}, {pipeline_mode = #tpu.pipeline_mode<synchronous>, transform_indices = @transform_1, window_bounds = array<i64: 16, 32>}, {transform_indices = @transform_2, window_bounds = array<i64: 1, 2, 32, 128>}, {transform_indices = @transform_3, window_bounds = array<i64: 1, 32, 2048>}, {transform_indices = @transform_4, window_bounds = array<i64: 1, 1, 2048>}, {transform_indices = @transform_5, window_bounds = array<i64: 1, 32, 2048>}, {transform_indices = @transform_6, window_bounds = array<i64: 1, 15, 32>}, {pipeline_mode = #tpu.pipeline_mode<synchronous>, transform_indices = @transform_7, window_bounds = array<i64: 8, 32>}]} {
    %c0_i32 = arith.constant 0 : i32
    %0 = arith.cmpi eq, %arg0, %c0_i32 : i32
    %1 = arith.extui %0 : i1 to i32
    %c0_i32_0 = arith.constant 0 : i32
    %2 = arith.cmpi ne, %1, %c0_i32_0 : i32
    scf.if %2 {
      %c0_58 = arith.constant 0 : index
      %c0_59 = arith.constant 0 : index
      %180 = vector.load %arg1[%c0_58, %c0_59] : memref<8x32xf32, #tpu.memory_space<vmem>>, vector<8x32xf32>
      %c0_60 = arith.constant 0 : index
      %c0_61 = arith.constant 0 : index
      %181 = vector.load %arg9[%c0_60, %c0_61] : memref<8x32xf32, #tpu.memory_space<vmem>>, vector<8x32xf32>
      tpu.vector_store %arg9[%c0_60, %c0_61], %180 {strides = array<i32>} : memref<8x32xf32, #tpu.memory_space<vmem>>, vector<8x32xf32>,
    } else {
    }
    %c0 = arith.constant 0 : index
    %c0_1 = arith.constant 0 : index
    %3 = vector.load %arg9[%c0, %c0_1] : memref<8x32xf32, #tpu.memory_space<vmem>>, vector<8x32xf32>
    %c0_2 = arith.constant 0 : index
    %c0_3 = arith.constant 0 : index
    %4 = vector.load %arg2[%c0_2, %c0_3] : memref<16x32xf32, #tpu.memory_space<vmem>>, vector<16x32xf32>
    %c0_4 = arith.constant 0 : index
    %c0_5 = arith.constant 0 : index
    %c0_6 = arith.constant 0 : index
    %5 = vector.load %arg7[%c0_4, %c0_5, %c0_6] : memref<1x15x32xf32, #tpu.memory_space<vmem>>, vector<1x15x32xf32>
    %6 = vector.shape_cast %5 : vector<1x15x32xf32> to vector<15x32xf32>
    %7 = vector.extract_strided_slice %6 {offsets = [0, 0], sizes = [1, 32], strides = [1, 1]} : vector<15x32xf32> to vector<1x32xf32>
    %8 = vector.extract_strided_slice %6 {offsets = [1, 0], sizes = [1, 32], strides = [1, 1]} : vector<15x32xf32> to vector<1x32xf32>
    %9 = vector.extract_strided_slice %6 {offsets = [2, 0], sizes = [1, 32], strides = [1, 1]} : vector<15x32xf32> to vector<1x32xf32>
    %10 = vector.extract_strided_slice %6 {offsets = [3, 0], sizes = [1, 32], strides = [1, 1]} : vector<15x32xf32> to vector<1x32xf32>
    %11 = vector.extract_strided_slice %6 {offsets = [4, 0], sizes = [1, 32], strides = [1, 1]} : vector<15x32xf32> to vector<1x32xf32>
    %12 = vector.extract_strided_slice %6 {offsets = [5, 0], sizes = [1, 32], strides = [1, 1]} : vector<15x32xf32> to vector<1x32xf32>
    %13 = vector.extract_strided_slice %6 {offsets = [6, 0], sizes = [1, 32], strides = [1, 1]} : vector<15x32xf32> to vector<1x32xf32>
    %14 = vector.extract_strided_slice %6 {offsets = [7, 0], sizes = [1, 32], strides = [1, 1]} : vector<15x32xf32> to vector<1x32xf32>
    %15 = vector.extract_strided_slice %6 {offsets = [8, 0], sizes = [1, 32], strides = [1, 1]} : vector<15x32xf32> to vector<1x32xf32>
    %16 = vector.extract_strided_slice %6 {offsets = [9, 0], sizes = [1, 32], strides = [1, 1]} : vector<15x32xf32> to vector<1x32xf32>
    %17 = vector.extract_strided_slice %6 {offsets = [10, 0], sizes = [1, 32], strides = [1, 1]} : vector<15x32xf32> to vector<1x32xf32>
    %18 = vector.extract_strided_slice %6 {offsets = [11, 0], sizes = [1, 32], strides = [1, 1]} : vector<15x32xf32> to vector<1x32xf32>
    %19 = vector.extract_strided_slice %6 {offsets = [12, 0], sizes = [1, 32], strides = [1, 1]} : vector<15x32xf32> to vector<1x32xf32>
    %20 = vector.extract_strided_slice %6 {offsets = [13, 0], sizes = [1, 32], strides = [1, 1]} : vector<15x32xf32> to vector<1x32xf32>
    %21 = vector.extract_strided_slice %6 {offsets = [14, 0], sizes = [1, 32], strides = [1, 1]} : vector<15x32xf32> to vector<1x32xf32>
    %c0_7 = arith.constant 0 : index
    %c0_8 = arith.constant 0 : index
    %c0_9 = arith.constant 0 : index
    %c0_10 = arith.constant 0 : index
    %22 = vector.load %arg3[%c0_7, %c0_8, %c0_9, %c0_10] : memref<1x2x32x128xf32, #tpu.memory_space<vmem>>, vector<1x1x32x128xf32>
    %23 = vector.shape_cast %22 : vector<1x1x32x128xf32> to vector<32x128xf32>
    %cst = arith.constant dense<0.000000e+00> : vector<8x128xf32>
    %24 = tpu.matmul %3, %23, %cst {dimension_numbers = #tpu.dot_dimension_numbers<[1], [0], [0], [1], [0, 0, 1, 1], [], []>} : vector<8x32xf32>, vector<32x128xf32>, vector<8x128xf32> -> vector<8x128xf32>
    %25 = vector.extract_strided_slice %24 {offsets = [0, 32], sizes = [8, 32], strides = [1, 1]} : vector<8x128xf32> to vector<8x32xf32>
    %26 = vector.broadcast %7 : vector<1x32xf32> to vector<8x32xf32>
    %27 = arith.addf %25, %26 : vector<8x32xf32>
    %28 = vector.extract_strided_slice %24 {offsets = [0, 64], sizes = [8, 32], strides = [1, 1]} : vector<8x128xf32> to vector<8x32xf32>
    %29 = vector.broadcast %8 : vector<1x32xf32> to vector<8x32xf32>
    %30 = arith.addf %28, %29 : vector<8x32xf32>
    %31 = vector.extract_strided_slice %24 {offsets = [0, 96], sizes = [8, 32], strides = [1, 1]} : vector<8x128xf32> to vector<8x32xf32>
    %32 = vector.broadcast %9 : vector<1x32xf32> to vector<8x32xf32>
    %33 = arith.addf %31, %32 : vector<8x32xf32>
    %34 = vector.shape_cast %27 : vector<8x32xf32> to vector<8x4x8xf32>
    %35 = tpu.transpose %34, [1, 0, 2] : vector<8x4x8xf32> -> vector<4x8x8xf32>
    %cst_11 = arith.constant 0.353553385 : f32
    %36 = vector.broadcast %cst_11 : f32 to vector<4x8x8xf32>
    %37 = arith.mulf %35, %36 : vector<4x8x8xf32>
    %38 = vector.shape_cast %30 : vector<8x32xf32> to vector<8x4x8xf32>
    %39 = tpu.transpose %38, [1, 0, 2] : vector<8x4x8xf32> -> vector<4x8x8xf32>
    %40 = vector.shape_cast %33 : vector<8x32xf32> to vector<8x4x8xf32>
    %41 = tpu.transpose %40, [1, 0, 2] : vector<8x4x8xf32> -> vector<4x8x8xf32>
    "tpu.trace_start"() <{level = 10 : i32, message = "hqd,hkd->hqk"}> : () -> ()
    %cst_12 = arith.constant dense<0.000000e+00> : vector<4x8x8xf32>
    %42 = tpu.matmul %37, %39, %cst_12 {dimension_numbers = #tpu.dot_dimension_numbers<[2], [2], [1], [1], [0, 0, 0, 1, 1, 1], [0], [0]>} : vector<4x8x8xf32>, vector<4x8x8xf32>, vector<4x8x8xf32> -> vector<4x8x8xf32>
    "tpu.trace_stop"() : () -> ()
    %cst_13 = arith.constant dense<0xFF800000> : vector<4x8xf32>
    %43 = vector.multi_reduction <maximumf>, %42, %cst_13 [2] : vector<4x8x8xf32> to vector<4x8xf32>
    %44 = vector.shape_cast %43 : vector<4x8xf32> to vector<4x8x1xf32>
    %45 = vector.broadcast %44 : vector<4x8x1xf32> to vector<4x8x8xf32>
    %46 = arith.subf %42, %45 : vector<4x8x8xf32>
    %47 = math.exp %46 : vector<4x8x8xf32>
    %cst_14 = arith.constant dense<0.000000e+00> : vector<4x8xf32>
    %48 = vector.multi_reduction <add>, %47, %cst_14 [2] : vector<4x8x8xf32> to vector<4x8xf32>
    %49 = vector.shape_cast %48 : vector<4x8xf32> to vector<4x8x1xf32>
    %50 = vector.broadcast %49 : vector<4x8x1xf32> to vector<4x8x8xf32>
    %51 = arith.divf %47, %50 : vector<4x8x8xf32>
    "tpu.trace_start"() <{level = 10 : i32, message = "hqk,hkd->hqd"}> : () -> ()
    %cst_15 = arith.constant dense<0.000000e+00> : vector<4x8x8xf32>
    %52 = tpu.matmul %51, %41, %cst_15 {dimension_numbers = #tpu.dot_dimension_numbers<[2], [1], [1], [2], [0, 0, 0, 1, 1, 2], [0], [0]>} : vector<4x8x8xf32>, vector<4x8x8xf32>, vector<4x8x8xf32> -> vector<4x8x8xf32>
    "tpu.trace_stop"() : () -> ()
    %53 = tpu.transpose %52, [1, 0, 2] : vector<4x8x8xf32> -> vector<8x4x8xf32>
    %54 = vector.shape_cast %53 : vector<8x4x8xf32> to vector<8x32xf32>
    %55 = vector.extract_strided_slice %23 {offsets = [0, 0], sizes = [32, 32], strides = [1, 1]} : vector<32x128xf32> to vector<32x32xf32>
    %cst_16 = arith.constant dense<0.000000e+00> : vector<8x32xf32>
    %56 = tpu.matmul %54, %55, %cst_16 {dimension_numbers = #tpu.dot_dimension_numbers<[1], [0], [0], [1], [0, 0, 1, 1], [], []>} : vector<8x32xf32>, vector<32x32xf32>, vector<8x32xf32> -> vector<8x32xf32>
    %57 = vector.broadcast %10 : vector<1x32xf32> to vector<8x32xf32>
    %58 = arith.addf %56, %57 : vector<8x32xf32>
    %59 = arith.addf %3, %58 : vector<8x32xf32>
    %cst_17 = arith.constant dense<0.000000e+00> : vector<8xf32>
    %60 = vector.multi_reduction <add>, %59, %cst_17 [1] : vector<8x32xf32> to vector<8xf32>
    %61 = vector.shape_cast %60 : vector<8xf32> to vector<8x1xf32>
    %cst_18 = arith.constant 3.200000e+01 : f32
    %62 = vector.broadcast %cst_18 : f32 to vector<8x1xf32>
    %63 = arith.divf %61, %62 : vector<8x1xf32>
    %64 = vector.broadcast %63 : vector<8x1xf32> to vector<8x32xf32>
    %65 = arith.subf %59, %64 : vector<8x32xf32>
    %66 = arith.mulf %65, %65 : vector<8x32xf32>
    %cst_19 = arith.constant dense<0.000000e+00> : vector<8xf32>
    %67 = vector.multi_reduction <add>, %66, %cst_19 [1] : vector<8x32xf32> to vector<8xf32>
    %68 = vector.shape_cast %67 : vector<8xf32> to vector<8x1xf32>
    %cst_20 = arith.constant 3.200000e+01 : f32
    %69 = vector.broadcast %cst_20 : f32 to vector<8x1xf32>
    %70 = arith.divf %68, %69 : vector<8x1xf32>
    %cst_21 = arith.constant 9.99999974E-6 : f32
    %71 = vector.broadcast %cst_21 : f32 to vector<8x1xf32>
    %72 = arith.addf %70, %71 : vector<8x1xf32>
    %73 = math.rsqrt %72 : vector<8x1xf32>
    %74 = vector.broadcast %73 : vector<8x1xf32> to vector<8x32xf32>
    %75 = arith.mulf %65, %74 : vector<8x32xf32>
    %76 = vector.broadcast %16 : vector<1x32xf32> to vector<8x32xf32>
    %77 = arith.mulf %75, %76 : vector<8x32xf32>
    %78 = vector.broadcast %17 : vector<1x32xf32> to vector<8x32xf32>
    %79 = arith.addf %77, %78 : vector<8x32xf32>
    %c0_22 = arith.constant 0 : index
    %c1 = arith.constant 1 : index
    %c0_23 = arith.constant 0 : index
    %c0_24 = arith.constant 0 : index
    %80 = vector.load %arg3[%c0_22, %c1, %c0_23, %c0_24] : memref<1x2x32x128xf32, #tpu.memory_space<vmem>>, vector<1x1x32x128xf32>
    %81 = vector.shape_cast %80 : vector<1x1x32x128xf32> to vector<32x128xf32>
    %cst_25 = arith.constant dense<0.000000e+00> : vector<8x128xf32>
    %82 = tpu.matmul %79, %81, %cst_25 {dimension_numbers = #tpu.dot_dimension_numbers<[1], [0], [0], [1], [0, 0, 1, 1], [], []>} : vector<8x32xf32>, vector<32x128xf32>, vector<8x128xf32> -> vector<8x128xf32>
    %cst_26 = arith.constant dense<0.000000e+00> : vector<16x128xf32>
    %83 = tpu.matmul %4, %81, %cst_26 {dimension_numbers = #tpu.dot_dimension_numbers<[1], [0], [0], [1], [0, 0, 1, 1], [], []>} : vector<16x32xf32>, vector<32x128xf32>, vector<16x128xf32> -> vector<16x128xf32>
    %84 = vector.extract_strided_slice %82 {offsets = [0, 32], sizes = [8, 32], strides = [1, 1]} : vector<8x128xf32> to vector<8x32xf32>
    %85 = vector.broadcast %11 : vector<1x32xf32> to vector<8x32xf32>
    %86 = arith.addf %84, %85 : vector<8x32xf32>
    %87 = vector.extract_strided_slice %83 {offsets = [0, 64], sizes = [16, 32], strides = [1, 1]} : vector<16x128xf32> to vector<16x32xf32>
    %88 = vector.broadcast %12 : vector<1x32xf32> to vector<16x32xf32>
    %89 = arith.addf %87, %88 : vector<16x32xf32>
    %90 = vector.extract_strided_slice %83 {offsets = [0, 96], sizes = [16, 32], strides = [1, 1]} : vector<16x128xf32> to vector<16x32xf32>
    %91 = vector.broadcast %13 : vector<1x32xf32> to vector<16x32xf32>
    %92 = arith.addf %90, %91 : vector<16x32xf32>
    %93 = vector.shape_cast %86 : vector<8x32xf32> to vector<8x4x8xf32>
    %94 = tpu.transpose %93, [1, 0, 2] : vector<8x4x8xf32> -> vector<4x8x8xf32>
    %cst_27 = arith.constant 0.353553385 : f32
    %95 = vector.broadcast %cst_27 : f32 to vector<4x8x8xf32>
    %96 = arith.mulf %94, %95 : vector<4x8x8xf32>
    %97 = vector.shape_cast %89 : vector<16x32xf32> to vector<16x4x8xf32>
    %98 = tpu.transpose %97, [1, 0, 2] : vector<16x4x8xf32> -> vector<4x16x8xf32>
    %99 = vector.shape_cast %92 : vector<16x32xf32> to vector<16x4x8xf32>
    %100 = tpu.transpose %99, [1, 0, 2] : vector<16x4x8xf32> -> vector<4x16x8xf32>
    "tpu.trace_start"() <{level = 10 : i32, message = "hqd,hkd->hqk"}> : () -> ()
    %cst_28 = arith.constant dense<0.000000e+00> : vector<4x8x16xf32>
    %101 = tpu.matmul %96, %98, %cst_28 {dimension_numbers = #tpu.dot_dimension_numbers<[2], [2], [1], [1], [0, 0, 0, 1, 1, 1], [0], [0]>} : vector<4x8x8xf32>, vector<4x16x8xf32>, vector<4x8x16xf32> -> vector<4x8x16xf32>
    "tpu.trace_stop"() : () -> ()
    %cst_29 = arith.constant dense<0xFF800000> : vector<4x8xf32>
    %102 = vector.multi_reduction <maximumf>, %101, %cst_29 [2] : vector<4x8x16xf32> to vector<4x8xf32>
    %103 = vector.shape_cast %102 : vector<4x8xf32> to vector<4x8x1xf32>
    %104 = vector.broadcast %103 : vector<4x8x1xf32> to vector<4x8x16xf32>
    %105 = arith.subf %101, %104 : vector<4x8x16xf32>
    %106 = math.exp %105 : vector<4x8x16xf32>
    %cst_30 = arith.constant dense<0.000000e+00> : vector<4x8xf32>
    %107 = vector.multi_reduction <add>, %106, %cst_30 [2] : vector<4x8x16xf32> to vector<4x8xf32>
    %108 = vector.shape_cast %107 : vector<4x8xf32> to vector<4x8x1xf32>
    %109 = vector.broadcast %108 : vector<4x8x1xf32> to vector<4x8x16xf32>
    %110 = arith.divf %106, %109 : vector<4x8x16xf32>
    "tpu.trace_start"() <{level = 10 : i32, message = "hqk,hkd->hqd"}> : () -> ()
    %cst_31 = arith.constant dense<0.000000e+00> : vector<4x8x8xf32>
    %111 = tpu.matmul %110, %100, %cst_31 {dimension_numbers = #tpu.dot_dimension_numbers<[2], [1], [1], [2], [0, 0, 0, 1, 1, 2], [0], [0]>} : vector<4x8x16xf32>, vector<4x16x8xf32>, vector<4x8x8xf32> -> vector<4x8x8xf32>
    "tpu.trace_stop"() : () -> ()
    %112 = tpu.transpose %111, [1, 0, 2] : vector<4x8x8xf32> -> vector<8x4x8xf32>
    %113 = vector.shape_cast %112 : vector<8x4x8xf32> to vector<8x32xf32>
    %114 = vector.extract_strided_slice %81 {offsets = [0, 0], sizes = [32, 32], strides = [1, 1]} : vector<32x128xf32> to vector<32x32xf32>
    %cst_32 = arith.constant dense<0.000000e+00> : vector<8x32xf32>
    %115 = tpu.matmul %113, %114, %cst_32 {dimension_numbers = #tpu.dot_dimension_numbers<[1], [0], [0], [1], [0, 0, 1, 1], [], []>} : vector<8x32xf32>, vector<32x32xf32>, vector<8x32xf32> -> vector<8x32xf32>
    %116 = vector.broadcast %14 : vector<1x32xf32> to vector<8x32xf32>
    %117 = arith.addf %115, %116 : vector<8x32xf32>
    %118 = arith.addf %79, %117 : vector<8x32xf32>
    %cst_33 = arith.constant dense<0.000000e+00> : vector<8xf32>
    %119 = vector.multi_reduction <add>, %118, %cst_33 [1] : vector<8x32xf32> to vector<8xf32>
    %120 = vector.shape_cast %119 : vector<8xf32> to vector<8x1xf32>
    %cst_34 = arith.constant 3.200000e+01 : f32
    %121 = vector.broadcast %cst_34 : f32 to vector<8x1xf32>
    %122 = arith.divf %120, %121 : vector<8x1xf32>
    %123 = vector.broadcast %122 : vector<8x1xf32> to vector<8x32xf32>
    %124 = arith.subf %118, %123 : vector<8x32xf32>
    %125 = arith.mulf %124, %124 : vector<8x32xf32>
    %cst_35 = arith.constant dense<0.000000e+00> : vector<8xf32>
    %126 = vector.multi_reduction <add>, %125, %cst_35 [1] : vector<8x32xf32> to vector<8xf32>
    %127 = vector.shape_cast %126 : vector<8xf32> to vector<8x1xf32>
    %cst_36 = arith.constant 3.200000e+01 : f32
    %128 = vector.broadcast %cst_36 : f32 to vector<8x1xf32>
    %129 = arith.divf %127, %128 : vector<8x1xf32>
    %cst_37 = arith.constant 9.99999974E-6 : f32
    %130 = vector.broadcast %cst_37 : f32 to vector<8x1xf32>
    %131 = arith.addf %129, %130 : vector<8x1xf32>
    %132 = math.rsqrt %131 : vector<8x1xf32>
    %133 = vector.broadcast %132 : vector<8x1xf32> to vector<8x32xf32>
    %134 = arith.mulf %124, %133 : vector<8x32xf32>
    %135 = vector.broadcast %18 : vector<1x32xf32> to vector<8x32xf32>
    %136 = arith.mulf %134, %135 : vector<8x32xf32>
    %137 = vector.broadcast %19 : vector<1x32xf32> to vector<8x32xf32>
    %138 = arith.addf %136, %137 : vector<8x32xf32>
    %c0_38 = arith.constant 0 : index
    %c0_39 = arith.constant 0 : index
    %c0_40 = arith.constant 0 : index
    %139 = vector.load %arg4[%c0_38, %c0_39, %c0_40] : memref<1x32x2048xbf16, #tpu.memory_space<vmem>>, vector<1x32x2048xbf16>
    %140 = vector.shape_cast %139 : vector<1x32x2048xbf16> to vector<32x2048xbf16>
    %141 = arith.truncf %138 : vector<8x32xf32> to vector<8x32xbf16>
    %cst_41 = arith.constant dense<0.000000e+00> : vector<8x2048xf32>
    %142 = tpu.matmul %141, %140, %cst_41 {dimension_numbers = #tpu.dot_dimension_numbers<[1], [0], [0], [1], [0, 0, 1, 1], [], []>} : vector<8x32xbf16>, vector<32x2048xbf16>, vector<8x2048xf32> -> vector<8x2048xf32>
    %c0_42 = arith.constant 0 : index
    %c0_43 = arith.constant 0 : index
    %c0_44 = arith.constant 0 : index
    %143 = vector.load %arg5[%c0_42, %c0_43, %c0_44] : memref<1x1x2048xf32, #tpu.memory_space<vmem>>, vector<1x1x2048xf32>
    %144 = vector.shape_cast %143 : vector<1x1x2048xf32> to vector<1x2048xf32>
    %145 = vector.broadcast %144 : vector<1x2048xf32> to vector<8x2048xf32>
    %146 = arith.addf %142, %145 : vector<8x2048xf32>
    %cst_45 = arith.constant 0.000000e+00 : f32
    %147 = vector.broadcast %cst_45 : f32 to vector<8x2048xf32>
    %148 = arith.maximumf %146, %147 : vector<8x2048xf32>
    %c0_46 = arith.constant 0 : index
    %c0_47 = arith.constant 0 : index
    %c0_48 = arith.constant 0 : index
    %149 = vector.load %arg6[%c0_46, %c0_47, %c0_48] : memref<1x32x2048xbf16, #tpu.memory_space<vmem>>, vector<1x32x2048xbf16>
    %150 = vector.shape_cast %149 : vector<1x32x2048xbf16> to vector<32x2048xbf16>
    %151 = arith.truncf %148 : vector<8x2048xf32> to vector<8x2048xbf16>
    %cst_49 = arith.constant dense<0.000000e+00> : vector<8x32xf32>
    %152 = tpu.matmul %151, %150, %cst_49 {dimension_numbers = #tpu.dot_dimension_numbers<[1], [1], [0], [0], [0, 0, 1, 0], [], []>} : vector<8x2048xbf16>, vector<32x2048xbf16>, vector<8x32xf32> -> vector<8x32xf32>
    %153 = vector.broadcast %15 : vector<1x32xf32> to vector<8x32xf32>
    %154 = arith.addf %152, %153 : vector<8x32xf32>
    %155 = arith.addf %138, %154 : vector<8x32xf32>
    %cst_50 = arith.constant dense<0.000000e+00> : vector<8xf32>
    %156 = vector.multi_reduction <add>, %155, %cst_50 [1] : vector<8x32xf32> to vector<8xf32>
    %157 = vector.shape_cast %156 : vector<8xf32> to vector<8x1xf32>
    %cst_51 = arith.constant 3.200000e+01 : f32
    %158 = vector.broadcast %cst_51 : f32 to vector<8x1xf32>
    %159 = arith.divf %157, %158 : vector<8x1xf32>
    %160 = vector.broadcast %159 : vector<8x1xf32> to vector<8x32xf32>
    %161 = arith.subf %155, %160 : vector<8x32xf32>
    %162 = arith.mulf %161, %161 : vector<8x32xf32>
    %cst_52 = arith.constant dense<0.000000e+00> : vector<8xf32>
    %163 = vector.multi_reduction <add>, %162, %cst_52 [1] : vector<8x32xf32> to vector<8xf32>
    %164 = vector.shape_cast %163 : vector<8xf32> to vector<8x1xf32>
    %cst_53 = arith.constant 3.200000e+01 : f32
    %165 = vector.broadcast %cst_53 : f32 to vector<8x1xf32>
    %166 = arith.divf %164, %165 : vector<8x1xf32>
    %cst_54 = arith.constant 9.99999974E-6 : f32
    %167 = vector.broadcast %cst_54 : f32 to vector<8x1xf32>
    %168 = arith.addf %166, %167 : vector<8x1xf32>
    %169 = math.rsqrt %168 : vector<8x1xf32>
    %170 = vector.broadcast %169 : vector<8x1xf32> to vector<8x32xf32>
    %171 = arith.mulf %161, %170 : vector<8x32xf32>
    %172 = vector.broadcast %20 : vector<1x32xf32> to vector<8x32xf32>
    %173 = arith.mulf %171, %172 : vector<8x32xf32>
    %174 = vector.broadcast %21 : vector<1x32xf32> to vector<8x32xf32>
    %175 = arith.addf %173, %174 : vector<8x32xf32>
    %c0_55 = arith.constant 0 : index
    %c0_56 = arith.constant 0 : index
    %176 = vector.load %arg9[%c0_55, %c0_56] : memref<8x32xf32, #tpu.memory_space<vmem>>, vector<8x32xf32>
    tpu.vector_store %arg9[%c0_55, %c0_56], %175 {strides = array<i32>} : memref<8x32xf32, #tpu.memory_space<vmem>>, vector<8x32xf32>,
    %c1_i32 = arith.constant 1 : i32
    %177 = arith.cmpi eq, %arg0, %c1_i32 : i32
    %178 = arith.extui %177 : i1 to i32
    %c0_i32_57 = arith.constant 0 : i32
    %179 = arith.cmpi ne, %178, %c0_i32_57 : i32
    scf.if %179 {
      %c0_58 = arith.constant 0 : index
      %c0_59 = arith.constant 0 : index
      %180 = vector.load %arg8[%c0_58, %c0_59] : memref<8x32xf32, #tpu.memory_space<vmem>>, vector<8x32xf32>
      tpu.vector_store %arg8[%c0_58, %c0_59], %175 {strides = array<i32>} : memref<8x32xf32, #tpu.memory_space<vmem>>, vector<8x32xf32>,
    } else {
    }
    return
  }
  func.func @transform_0(%arg0: i32) -> (i32, i32) {
    %c0_i32 = arith.constant 0 : i32
    %c0_i32_0 = arith.constant 0 : i32
    %c0_i32_1 = arith.constant 0 : i32
    return %c0_i32, %c0_i32_0 : i32, i32
  }
  func.func @transform_1(%arg0: i32) -> (i32, i32) {
    %c0_i32 = arith.constant 0 : i32
    %c0_i32_0 = arith.constant 0 : i32
    %c0_i32_1 = arith.constant 0 : i32
    return %c0_i32, %c0_i32_0 : i32, i32
  }
  func.func @transform_2(%arg0: i32) -> (i32, i32, i32, i32) {
    %c0_i32 = arith.constant 0 : i32
    %c0_i32_0 = arith.constant 0 : i32
    %c0_i32_1 = arith.constant 0 : i32
    %c0_i32_2 = arith.constant 0 : i32
    return %arg0, %c0_i32, %c0_i32_0, %c0_i32_1 : i32, i32, i32, i32
  }
  func.func @transform_3(%arg0: i32) -> (i32, i32, i32) {
    %c0_i32 = arith.constant 0 : i32
    %c0_i32_0 = arith.constant 0 : i32
    %c0_i32_1 = arith.constant 0 : i32
    return %arg0, %c0_i32, %c0_i32_0 : i32, i32, i32
  }
  func.func @transform_4(%arg0: i32) -> (i32, i32, i32) {
    %c0_i32 = arith.constant 0 : i32
    %c0_i32_0 = arith.constant 0 : i32
    %c0_i32_1 = arith.constant 0 : i32
    return %arg0, %c0_i32, %c0_i32_0 : i32, i32, i32
  }
  func.func @transform_5(%arg0: i32) -> (i32, i32, i32) {
    %c0_i32 = arith.constant 0 : i32
    %c0_i32_0 = arith.constant 0 : i32
    %c0_i32_1 = arith.constant 0 : i32
    return %arg0, %c0_i32, %c0_i32_0 : i32, i32, i32
  }
  func.func @transform_6(%arg0: i32) -> (i32, i32, i32) {
    %c0_i32 = arith.constant 0 : i32
    %c0_i32_0 = arith.constant 0 : i32
    %c0_i32_1 = arith.constant 0 : i32
    return %arg0, %c0_i32, %c0_i32_0 : i32, i32, i32
  }
  func.func @transform_7(%arg0: i32) -> (i32, i32) {
    %c0_i32 = arith.constant 0 : i32
    %c0_i32_0 = arith.constant 0 : i32
    %c0_i32_1 = arith.constant 0 : i32
    return %c0_i32, %c0_i32_0 : i32, i32
  }
}

</mosaic_0001>

<bundles_post_ra>
// kernel: tpu_custom_call.1
= control target key start
LH: loop header
LB: loop body
LE: loop exit
PB: predicated region body
PF: predicated region fallthrough
CT: control target
= control target key end

     0   :  { %s6743_s0 = inlined_call_operand.vmem [shape: f32[8,32], index: 0, kind: input, shape index: {}]   ;;  %s6744_s1 = inlined_call_operand.vmem [shape: f32[16,32], index: 1, kind: input, shape index: {}]   ;;  %s6745_s2 = inlined_call_operand.hbm [shape: f32[2,2,32,128], index: 2, kind: input, shape index: {}]   ;;  %s6746_s3 = inlined_call_operand.hbm [shape: bf16[2,32,2048], index: 3, kind: input, shape index: {}]   ;;  %s6747_s4 = inlined_call_operand.vmem [shape: f32[2,1,2048], index: 4, kind: input, shape index: {}]   ;;  %s6748_s5 = inlined_call_operand.hbm [shape: bf16[2,32,2048], index: 5, kind: input, shape index: {}]   ;;  %s6749_s6 = inlined_call_operand.vmem [shape: f32[2,15,32], index: 6, kind: input, shape index: {}]   ;;  %s6750_s7 = inlined_call_operand.hbm [shape: f32[8,32], index: 7, kind: output, shape index: {}]  }
   0x1   :  { %6754 = sst [smem:[#allocation13_spill]] %s6746_s3 }
   0x2   :  { %12 = vsyncpa [#allocation4], 0 }
   0x3   :  { %14 = vsyncpa [#allocation4 + $0x1], 0 }
   0x4   :  { %15 = vsyncpa [#allocation7], 0 }
   0x5   :  { %17 = vsyncpa [#allocation7 + $0x1], 0 }
   0x6   :  { %18 = vsyncpa [#allocation5], 0  ;;  %s5837_s24 = smov 0   ;;  %s5839_s25 = smov 0  }
   0x7   :  { %s5841_s26 = smov 0   ;;  %s5843_s27 = smov 0  }
   0x8 LB: > { %s5856_s28 = sadd.s32 4294967295, %s5772_s27   ;;  %s5859_s29 = sadd.s32 1, %s5772_s27   ;;  %s5772_s27 = sphi %s5843_s27, %s6769_s27   ;;  %s5768_s26 = sphi %s5841_s26, %s6768_s26   ;;  %s5764_s25 = sphi %s5839_s25, %s6767_s25   ;;  %s5760_s24 = sphi %s5837_s24, %s6766_s24  }
   0x9   : > { %s70_s30 = ssub.s32 %s5772_s27, %s5859_s29  ;;  %s73_s8 = sadd.s32 1, %s5768_s26 }
   0xa   : > { %p71_p0 = scmp.eq.s32.totalorder %s70_s30, 0  ;;  %p80_p1 = scmp.ne.s32.totalorder %s5768_s26, %s5764_s25 }
   0xb   : > { %p81_p2 = scmp.eq.s32.totalorder %s5772_s27, 0  ;;  %p86_p3 = scmp.ne.s32.totalorder %s5764_s25, %s5760_s24 }
   0xc   : > { %s5869_s9 = scalar_select %p71_p0, %s5768_s26, %s73_s8  }
   0xd   : > { %p82_p4 = por %p81_p2, %p80_p1  ;;  %p87_p5 = scmp.eq.s32.totalorder %s5856_s28, 0 }
   0xe   : > { %p5519_p6 = scmp.lt.s32.totalorder %s5772_s27, 2  ;;  %s5878_s11 = sand.u32 1, %s5768_s26  }
   0xf   : > { %p5873_p7 = por %p87_p5, %p86_p3  ;;  %s262_s13 = sand.u32 1, %s5772_s27  }
  0x10   : > { %p5880_p8 = pnand %p5519_p6, %p82_p4  ;;  %s5069_s14 = sshll.u32 %s5878_s11, 8 }
  0x11   : > { %s6755_s10 = scalar_select %p5873_p7, 1, 0 }
  0x12   : > { %s5219_s15 = sshll.u32 %s5772_s27, 12  ;;  %s266_s16 = scalar_lea.vmem [#allocation6], %s5069_s14 }
  0x13   : > { %s273_s17 = sshll.u32 %s266_s16, 4  ;;  %s6757_s3 = sld [smem:[#allocation13_spill]]  ;;  %s5896_s17 = int_to_ptr.vmem [resolvable:$true] %s273_s17 }
  0x14   : > { %s5898_s21 = scalar_lea.sflag [#allocation7], %s262_s13  ;;  %p5904_p10 = pneg %p5880_p8 }
  0x19   : > { %s5894_s20 = scalar_lea.hbm %s6757_s3, %s5219_s15  ;;  %s5619_s8 = scalar_lea.hbm %s6757_s3, 8192 }
  0x1a   : > { %s5614_s22 = scalar_lea.hbm %s5894_s20, 4096  ;;  %p5620_p13 = scmp.lt.u32.totalorder %s5894_s20, %s6757_s3 }
  0x1b   : > { %p5615_p9 = scmp.ne.s32.totalorder %s5894_s20, %s5614_s22  ;;  %p5621_p0 = scmp.lt.u32.totalorder %s5619_s8, %s5614_s22 }
  0x1c   : > { %p5623_p2 = scmp.lt.u32.totalorder %s5614_s22, %s5894_s20 }
  0x1d   : > { %p5617_p11 = pnand %p5904_p10, %p5615_p9  ;;  %p5622_p1 = por %p5621_p0, %p5620_p13 }
  0x1f   : > { %p5618_p12 = pneg %p5617_p11  ;;  %p5624_p3 = por %p5623_p2, %p5622_p1 }
  0x21   : > { %p5625_p4 = pnand %p5624_p3, %p5618_p12 }
  0x23   : > { %5628 = shalt.err (!%p5625_p4)
}
  0x24   : > { %s5629_s13 = scalar_lea.vmem %s5896_s17, 4096  ;;  %s5774_s19 = smov [#allocation6]  }
  0x25   : > { %p5630_p5 = scmp.ne.s32.totalorder %s5896_s17, %s5629_s13  ;;  %s5634_s24 = sshll.u32 %s5774_s19, 4  ;;  %s5635_s24 = int_to_ptr.vmem [resolvable:$false] %s5634_s24 }
  0x26   : > { %s5636_s30 = scalar_lea.vmem %s5635_s24, 8192  ;;  %p5637_p11 = scmp.lt.s32.totalorder %s5896_s17, %s5635_s24 }
  0x27   : > { %p5632_p6 = pnand %p5630_p5, %p5904_p10  ;;  %p5638_p7 = scmp.lt.s32.totalorder %s5636_s30, %s5629_s13 }
  0x29   : > { %p5633_p9 = pneg %p5632_p6  ;;  %p5639_p13 = por %p5638_p7, %p5637_p11 }
  0x2b   : > { %p5640_p0 = pnand %p5639_p13, %p5633_p9 }
  0x2d   : > { %5643 = shalt.err (!%p5640_p0)
}
  0x2e   : > { %s6752_s22 = smov 1024   ;;  %s6753_s8 = smov 64  }
  0x2f   : > { %5515 = dma.hbm_to_vmem [thread:$0]  (!%p5880_p8), %s5894_s20, 4096, %s5896_s17, %s5898_s21, %s6752_s22, %s6752_s22, %s6753_s8  }
  0x30   : > { %s5936_s13 = scalar_lea.hbm %s6748_s5, %s5219_s15  ;;  %s294_s19 = scalar_lea.vmem [#allocation8], %s5069_s14 }
  0x31   : > { %s301_s24 = sshll.u32 %s294_s19, 4  ;;  %p5075_p7 = scmp.ge.s32.totalorder %s5772_s27, 1  ;;  %s5941_s24 = int_to_ptr.vmem [resolvable:$true] %s301_s24 }
  0x32   : > { %p317_p12 = scmp.lt.s32.totalorder %s5772_s27, 3  ;;  %s5066_s30 = sshll.u32 %s5878_s11, 6 }
  0x33   : > { %s5218_s17 = sshll.u32 %s5772_s27, 10  ;;  %s245_s20 = scalar_lea.vmem [#allocation3], %s5066_s30 }
  0x34   : > { %p5945_p1 = pnand %p5075_p7, %p317_p12  ;;  %s252_s22 = sshll.u32 %s245_s20, 4  ;;  %s5955_s22 = int_to_ptr.vmem [resolvable:$true] %s252_s22 }
  0x35   : > { %s5953_s15 = scalar_lea.hbm %s6745_s2, %s5218_s17  ;;  %s242_s14 = scalar_lea.sflag [#allocation4], %s5878_s11 }
  0x36   : > { %s6759_s3 = scalar_select %p5945_p1, 1, 0 }
  0x37   : > { %s5644_s18 = scalar_lea.hbm %s5953_s15, 1024  ;;  %s5649_s30 = scalar_lea.hbm %s6745_s2, 2048 }
  0x38   : > { %p5645_p2 = scmp.ne.s32.totalorder %s5953_s15, %s5644_s18  ;;  %p5650_p5 = scmp.lt.u32.totalorder %s5953_s15, %s6745_s2 }
  0x39   : > { %p5651_p6 = scmp.lt.u32.totalorder %s5649_s30, %s5644_s18  ;;  %p5653_p11 = scmp.lt.u32.totalorder %s5644_s18, %s5953_s15 }
  0x3a   : > { %p5647_p3 = pnand %p5645_p2, %p5904_p10 }
  0x3b   : > { %p5652_p9 = por %p5651_p6, %p5650_p5 }
  0x3c   : > { %p5648_p4 = pneg %p5647_p3 }
  0x3d   : > { %p5654_p13 = por %p5653_p11, %p5652_p9 }
  0x3f   : > { %p5655_p0 = pnand %p5654_p13, %p5648_p4 }
  0x41   : > { %5658 = shalt.err (!%p5655_p0)
}
  0x42   : > { %s5659_s17 = scalar_lea.vmem %s5955_s22, 1024  ;;  %s5777_s16 = smov [#allocation3]  }
  0x43   : > { %p5660_p7 = scmp.ne.s32.totalorder %s5955_s22, %s5659_s17  ;;  %s5664_s27 = sshll.u32 %s5777_s16, 4  ;;  %s5665_s27 = int_to_ptr.vmem [resolvable:$false] %s5664_s27 }
  0x44   : > { %s5666_s19 = scalar_lea.vmem %s5665_s27, 2048  ;;  %p5667_p3 = scmp.lt.s32.totalorder %s5955_s22, %s5665_s27 }
  0x45   : > { %p5662_p12 = pnand %p5660_p7, %p5904_p10  ;;  %p5668_p1 = scmp.lt.s32.totalorder %s5666_s19, %s5659_s17 }
  0x47   : > { %p5663_p2 = pneg %p5662_p12  ;;  %p5669_p5 = por %p5668_p1, %p5667_p3 }
  0x49   : > { %p5670_p6 = pnand %p5669_p5, %p5663_p2 }
  0x4b   : > { %5673 = shalt.err (!%p5670_p6)
}
  0x4c   : > { %s5778_s18 = smov 128   ;;  %s5779_s30 = smov 8  }
  0x4d   : > { %5512 = dma.hbm_to_vmem [thread:$0]  (!%p5880_p8), %s5953_s15, 1024, %s5955_s22, %s242_s14, %s5778_s18, %s5778_s18, %s5779_s30  }
  0x4e   : > { %s5674_s20 = scalar_lea.hbm %s5936_s13, 4096  ;;  %s5679_s16 = scalar_lea.hbm %s6748_s5, 8192 }
  0x4f   : > { %p5675_p4 = scmp.ne.s32.totalorder %s5936_s13, %s5674_s20  ;;  %p5680_p11 = scmp.lt.u32.totalorder %s5936_s13, %s6748_s5 }
  0x50   : > { %p5681_p13 = scmp.lt.u32.totalorder %s5679_s16, %s5674_s20  ;;  %p5683_p7 = scmp.lt.u32.totalorder %s5674_s20, %s5936_s13 }
  0x51   : > { %p5677_p1 = pnand %p5675_p4, %p5904_p10 }
  0x52   : > { %p5682_p0 = por %p5681_p13, %p5680_p11 }
  0x53   : > { %p5678_p9 = pneg %p5677_p1 }
  0x54   : > { %p5684_p12 = por %p5683_p7, %p5682_p0 }
  0x56   : > { %p5685_p2 = pnand %p5684_p12, %p5678_p9 }
  0x58   : > { %5688 = shalt.err (!%p5685_p2)
}
  0x59   : > { %s5689_s11 = scalar_lea.vmem %s5941_s24, 4096  ;;  %s5780_s22 = smov [#allocation8]  }
  0x5a   : > { %p5690_p3 = scmp.ne.s32.totalorder %s5941_s24, %s5689_s11  ;;  %s5694_s15 = sshll.u32 %s5780_s22, 4  ;;  %s5695_s15 = int_to_ptr.vmem [resolvable:$false] %s5694_s15 }
  0x5b   : > { %s5696_s14 = scalar_lea.vmem %s5695_s15, 8192  ;;  %p5697_p4 = scmp.lt.s32.totalorder %s5941_s24, %s5695_s15 }
  0x5c   : > { %p5692_p5 = pnand %p5690_p3, %p5904_p10  ;;  %p5698_p1 = scmp.lt.s32.totalorder %s5696_s14, %s5689_s11 }
  0x5e   : > { %p5693_p6 = pneg %p5692_p5  ;;  %p5699_p11 = por %p5698_p1, %p5697_p4 }
  0x60   : > { %p5700_p13 = pnand %p5699_p11, %p5693_p6 }
  0x62   : > { %5703 = shalt.err (!%p5700_p13)
}
  0x63   : > { %s6760_s18 = smov 64   ;;  %s6761_s30 = smov 1024  }
  0x64   : > { %5518 = dma.hbm_to_vmem [thread:$0]  (!%p5880_p8), %s5936_s13, 4096, %s5941_s24, %s5898_s21, %s6761_s30, %s6761_s30, %s6760_s18  }
  0x65   : > { %p6762_p10 = scmp.ne.s32.totalorder %s6759_s3, 0 }
  0x66   : > { %s323_s23 = sand.u32 (!%p6762_p10), 1, %s5764_s25   ;;  %p6763_p9 = scmp.ne.s32.totalorder (!%p6762_p10), %s6755_s10, 0 }
  0x67   : > { %321 = sbr.rel (%p6762_p10) target bundleno = 4826 (0x12da), region = 48  ;;  %s5076_s20 = sshll.u32 (!%p6762_p10), %s323_s23, 6 }
  0x68   : > { %s324_s8 = scalar_lea.sflag (!%p6762_p10), [#allocation4], %s323_s23  ;;  %s6009_s17 = scalar_lea.vmem (!%p6762_p10), [#allocation3], %s5076_s20 }
  0x6e   : > { %5747 = dma.done.wait (%p6763_p9), %s324_s8, 1024  }
  0x6f   : > { %5749 = vsyncadd (%p6763_p9), %s324_s8, 4294966272  ;;  %s332_s12 = sand.u32 1, %s5856_s28   ;;  %s5077_s16 = sshll.u32 %s323_s23, 8 }
  0x70   : > { %s333_s21 = scalar_lea.sflag [#allocation7], %s332_s12  ;;  %s6016_s13 = scalar_lea.vmem [#allocation6], %s5077_s16 }
  0x71   : > { %5751 = dma.done.wait (%p6763_p9), %s333_s21, 8192  }
  0x72   : > { %5753 = vsyncadd (%p6763_p9), %s333_s21, 4294959104  ;;  %p390_p8 = scmp.lt.s32.totalorder %s5856_s28, 1  ;;  %s6034_s18 = scalar_lea.vmem [#allocation8], %s5077_s16 }
  0x73   : > { %p5082_p0 = scmp.ne.s32.totalorder %s5856_s28, 0 }
  0x74   : > { %s391_s3 = scalar_select %p390_p8, %s5856_s28, 1 }
  0x75   : > { %403 = sbr.rel (%p5082_p0) target bundleno = 124 (0x7c), region = 64  ;;  %v404_v0 = vld [vmem:[%s6743_s0] sm:$0xff] (!%p5082_p0)  ;;  %vm405_vm0 = vcmask (!%p5082_p0), 261120  }
  0x76   : > { %s5079_s24 = sshll.u32 %s391_s3, 4  ;;  %406 = vst.msk [vmem:[#allocation2] sm:$0xff] (!%p5082_p0), %vm405_vm0, %v404_v0 }
  0x77   : > { %s6027_s11 = scalar_lea.vmem %s6747_s4, %s5079_s24  ;;  %s6032_s14 = scalar_lea.vmem %s6749_s6, %s5079_s24 }
  0x7c PF: > { %v412_v1 = vld [vmem:[%s6009_s17] sm:$0xff]  ;;  %v413_v2 = vld [vmem:[%s6009_s17 + $0x8] sm:$0xff]  ;;  %v414_v3 = vld [vmem:[%s6009_s17 + $0x10] sm:$0xff]  ;;  %v490_v4 = vlaneseq  ;;  %v5781_v5 = vmov 0.0|0.0   ;;  %vm5782_vm1 = vmmov 0   ;;  %v5783_v8 = vmov 0.0  }
  0x7d   : > { %5439 = vmatprep.subr.bf16.mxu0 %v5781_v5  ;;  %v6044_v6 = vpack.c.bf16 %v413_v2, %v412_v1  ;;  %v415_v7 = vld [vmem:[%s6009_s17 + $0x18] sm:$0xff]  ;;  %5296 = vmatprep.mubr.msk.f32.mxu0 %vm5782_vm1, %v5783_v8  ;;  %vm416_vm2 = vcmask 261120   ;;  %s5784_s23 = smov 64   ;;  %s5785_s20 = smov 32   ;;  %v5790_v32 = vmov 1983009808  }
  0x7e   : > { %v6049_v9 = vshrl.u32 %v490_v4, 7  ;;  %5299 = vmatprep.subr.mxu1 %v5783_v8  ;;  %5301 = vmatprep.mubr.msk.f32.mxu1 %vm5782_vm1, %v5783_v8  ;;  %v6055_v10 = vpack.c.bf16 %v415_v7, %v414_v3  ;;  %v6058_v11 = vld [vmem:[%s6032_s14] sm:$0xff]  ;;  %s5786_s8 = smov 104   ;;  %s5787_s12 = smov 120   ;;  %v539_v33 = vunpack.c.l.s4 %v5790_v32  ;;  %v5791_v34 = vmov 1934713408  }
  0x7f   : > { %5441 = vmatpush3.bf16.msra.mxu0 %v6044_v6  ;;  %v6070_v15 = vld [vmem:[#allocation2] sm:$0xff]  ;;  %s5788_s16 = smov 112   ;;  %s5789_s21 = smov 96   ;;  %v571_v35 = vunpack.c.l.s4 %v5791_v34  ;;  %vm986_vm3 = vcmask 64512   ;;  %vm1776_vm4 = vcmask 130048   ;;  %vm1778_vm5 = vcmask 195584  }
  0x80   : > { %5442 = vmatprep.subr.bf16.mxu0 %v5781_v5  ;;  %v6062_v12 = vsub.s32 1, %v6049_v9  ;;  %v6065_v13 = vsub.s32 0, %v6049_v9  ;;  %v6097_v26 = vsub.s32 2, %v6049_v9  ;;  %v540_v36 = vunpack.c.0.s8 %v539_v33  ;;  %s5792_s3 = smov 16   ;;  %s5793_s24 = smov 8   ;;  %vm6380_vm6 = vmpackc.low %vm986_vm3, %vm986_vm3 }
  0x81   : > { %v572_v39 = vunpack.c.0.s8 %v571_v35  ;;  %s5794_s27 = smov 24   ;;  %p5213_p7 = scmp.ne.s32.totalorder %s5856_s28, 1 }
  0x82   : > { %v502_v14 = vrot.slane %v6058_v11, %v6062_v12  ;;  %v493_v16 = vrot.slane %v6058_v11, %v6065_v13  ;;  %v511_v29 = vrot.slane %v6058_v11, %v6097_v26  ;;  %v6106_v40 = vsub.s32 %v540_v36, %v6049_v9 }
  0x83   : > { %5444 = vmatpush3.bf16.msra.mxu0 %v6055_v10  ;;  %v6109_v47 = vsub.s32 %v572_v39, %v6049_v9 }
  0x84   : > { %504 = vrot.lane.b32.xlu0 %v502_v14, %s5784_s23  ;;  %5319 = vmatprep.subr.mxu0 %v5783_v8 }
  0x86   : > { %5297 = vmatmul.mubr.msk.f32.vlgmr.msra.gmra.mrb[0].mxu0 %vm416_vm2, %v6070_v15 }
  0x87   : > { %5321 = vmatprep.mubr.msk.f32.mxu0 %vm5782_vm1, %v5783_v8 }
  0x88   : > { %495 = vrot.lane.b32.xlu0 %v493_v16, %s5785_s20 }
  0xf6   : > { %v505_v17 = vpop.permute.xlu0 %504 }
  0xfa   : > { %v496_v21 = vpop.permute.xlu0 %495 }
 0x159   : > { %v6081_v18 = vpop.f32.mrb[0].mxu0 }
 0x15a   : > { %v507_v19 = vadd.f32 %v505_v17, %v6081_v18  ;;  %v5298_v20 = vpop.f32.mrb[1].mxu0  ;;  %v498_v22 = vadd.f32 %v496_v21, %v6081_v18 }
 0x15c   : > { %681 = vrot.lane.b32.xlu0 %v507_v19, %s5786_s8  ;;  %677 = vrot.lane.b32.xlu1 %v507_v19, %s5787_s12 }
 0x160   : > { %679 = vrot.lane.b32.xlu1 %v507_v19, %s5788_s16  ;;  %520 = vrot.lane.b32.xlu0 %v498_v22, %s5788_s16 }
 0x164   : > { %683 = vrot.lane.b32.xlu0 %v507_v19, %s5784_s23  ;;  %518 = vrot.lane.b32.xlu1 %v498_v22, %s5787_s12 }
 0x168   : > { %524 = vrot.lane.b32.xlu0 %v498_v22, %s5789_s21  ;;  %522 = vrot.lane.b32.xlu1 %v498_v22, %s5786_s8 }
 0x1ce   : > { %v678_v23 = vpop.permute.xlu1 %677  ;;  %v682_v24 = vpop.permute.xlu0 %681 }
 0x1cf   : > { %685 = vrot.lane.b32.xlu1 %v678_v23, %s5784_s23 }
 0x1d2   : > { %v680_v25 = vpop.permute.xlu1 %679  ;;  %v521_v27 = vpop.permute.xlu0 %520 }
 0x1d3   : > { %687 = vrot.lane.b32.xlu0 %v680_v25, %s5784_s23  ;;  %689 = vrot.lane.b32.xlu1 %v682_v24, %s5784_s23 }
 0x1d6   : > { %v519_v28 = vpop.permute.xlu1 %518  ;;  %v684_v31 = vpop.permute.xlu0 %683 }
 0x1d7   : > { %528 = vrot.lane.b32.xlu0 %v521_v27, %s5789_s21  ;;  %526 = vrot.lane.b32.xlu1 %v519_v28, %s5789_s21 }
 0x1da   : > { %v523_v30 = vpop.permute.xlu1 %522  ;;  %v525_v37 = vpop.permute.xlu0 %524 }
 0x1db   : > { %513 = vrot.lane.b32.xlu0 %v511_v29, %s5789_s21  ;;  %530 = vrot.lane.b32.xlu1 %v523_v30, %s5789_s21 }
 0x241   : > { %v686_v38 = vpop.permute.xlu1 %685 }
 0x245   : > { %v688_v41 = vpop.permute.xlu0 %687  ;;  %v690_v42 = vpop.permute.xlu1 %689 }
 0x246   : > { %v695_v43 = vcombine.low %v684_v31, %v688_v41  ;;  %v696_v44 = vcombine.high %v684_v31, %v688_v41  ;;  %v711_v45 = vcombine.low %v686_v38, %v690_v42  ;;  %v712_v46 = vcombine.high %v686_v38, %v690_v42 }
 0x248   : > { %v703_v48 = vrot.slane %v695_v43, %v6106_v40  ;;  %v710_v49 = vrot.slane %v696_v44, %v6106_v40  ;;  %v719_v50 = vrot.slane %v711_v45, %v6106_v40  ;;  %v726_v51 = vrot.slane %v712_v46, %v6106_v40 }
 0x249   : > { %v527_v52 = vpop.permute.xlu1 %526  ;;  %v529_v57 = vpop.permute.xlu0 %528 }
 0x24a   : > { %v727_v53 = vcombine.low %v703_v48, %v719_v50  ;;  %v728_v54 = vcombine.high %v703_v48, %v719_v50  ;;  %v743_v55 = vcombine.low %v710_v49, %v726_v51  ;;  %v744_v56 = vcombine.high %v710_v49, %v726_v51 }
 0x24b   : > { %v536_v62 = vcombine.low %v525_v37, %v529_v57  ;;  %v537_v63 = vcombine.high %v525_v37, %v529_v57 }
 0x24c   : > { %v735_v58 = vrot.slane %v727_v53, %v6109_v47  ;;  %v742_v59 = vrot.slane %v728_v54, %v6109_v47  ;;  %v751_v60 = vrot.slane %v743_v55, %v6109_v47  ;;  %v758_v61 = vrot.slane %v744_v56, %v6109_v47 }
 0x24d   : > { %v531_v0 = vpop.permute.xlu1 %530  ;;  %v544_v21 = vrot.slane %v536_v62, %v6106_v40  ;;  %v551_v22 = vrot.slane %v537_v63, %v6106_v40 }
 0x24e   : > { %v763_v1 = vcombine.low %v735_v58, %v742_v59  ;;  %v5086_v2 = vcombine.high %v735_v58, %v742_v59  ;;  %v779_v3 = vcombine.low %v751_v60, %v758_v61  ;;  %v5087_v4 = vcombine.high %v751_v60, %v758_v61 }
 0x24f   : > { %v552_v7 = vcombine.low %v527_v52, %v531_v0  ;;  %v553_v14 = vcombine.high %v527_v52, %v531_v0 }
 0x250   : > { %v770_v16 = vrot.slane %v763_v1, %v6106_v40  ;;  %v778_v17 = vrot.slane %v5086_v2, %v6106_v40  ;;  %v786_v19 = vrot.slane %v779_v3, %v6106_v40  ;;  %v794_v20 = vrot.slane %v5087_v4, %v6106_v40 }
 0x251   : > { %v560_v23 = vrot.slane %v552_v7, %v6106_v40  ;;  %v567_v24 = vrot.slane %v553_v14, %v6106_v40 }
 0x252   : > { %v795_v25 = vcombine.low %v770_v16, %v778_v17  ;;  %v811_v27 = vcombine.low %v786_v19, %v794_v20  ;;  %v796_v55 = vcombine.high %v770_v16, %v778_v17  ;;  %v812_v56 = vcombine.high %v786_v19, %v794_v20 }
 0x253   : > { %v568_v28 = vcombine.low %v544_v21, %v560_v23  ;;  %v569_v29 = vcombine.high %v544_v21, %v560_v23  ;;  %v584_v30 = vcombine.low %v551_v22, %v567_v24  ;;  %v585_v31 = vcombine.high %v551_v22, %v567_v24 }
 0x254   : > { %v803_v32 = vrot.slane %v795_v25, %v6109_v47  ;;  %v819_v33 = vrot.slane %v811_v27, %v6109_v47  ;;  %v810_v63 = vrot.slane %v796_v55, %v6109_v47  ;;  %v826_v0 = vrot.slane %v812_v56, %v6109_v47 }
 0x255   : > { %v576_v34 = vrot.slane %v568_v28, %v6109_v47  ;;  %v583_v35 = vrot.slane %v569_v29, %v6109_v47  ;;  %v592_v36 = vrot.slane %v584_v30, %v6109_v47  ;;  %v599_v37 = vrot.slane %v585_v31, %v6109_v47  ;;  %v514_v30 = vpop.permute.xlu0 %513 }
 0x256   : > { %v827_v38 = vcombine.low %v803_v32, %v819_v33  ;;  %v828_v62 = vcombine.high %v803_v32, %v819_v33  ;;  %v829_v3 = vcombine.low %v810_v63, %v826_v0  ;;  %v830_v14 = vcombine.high %v810_v63, %v826_v0 }
 0x257   : > { %v604_v39 = vcombine.low %v576_v34, %v583_v35  ;;  %v5084_v41 = vcombine.high %v576_v34, %v583_v35  ;;  %v620_v42 = vcombine.low %v592_v36, %v599_v37  ;;  %v5085_v43 = vcombine.high %v592_v36, %v599_v37 }
 0x258   : > { %5300 = vmatpush3.xpose.msk.msra.mxu1 %vm986_vm3, %v827_v38  ;;  %v516_v31 = vadd.f32 %v514_v30, %v6081_v18 }
 0x259   : > { %v611_v44 = vrot.slane %v604_v39, %v6106_v40  ;;  %v619_v45 = vrot.slane %v5084_v41, %v6106_v40  ;;  %v627_v46 = vrot.slane %v620_v42, %v6106_v40  ;;  %v635_v48 = vrot.slane %v5085_v43, %v6106_v40  ;;  %5304 = vmatprep.subr.mxu1 %v5783_v8 }
 0x25b   : > { %v636_v49 = vcombine.low %v611_v44, %v619_v45  ;;  %v652_v50 = vcombine.low %v627_v46, %v635_v48  ;;  %v637_v51 = vcombine.high %v611_v44, %v619_v45  ;;  %v653_v52 = vcombine.high %v627_v46, %v635_v48 }
 0x25d   : > { %v644_v53 = vrot.slane %v636_v49, %v6109_v47  ;;  %v660_v54 = vrot.slane %v652_v50, %v6109_v47  ;;  %v651_v60 = vrot.slane %v637_v51, %v6109_v47  ;;  %v667_v61 = vrot.slane %v653_v52, %v6109_v47 }
 0x25f   : > { %v668_v57 = vcombine.low %v644_v53, %v660_v54  ;;  %v669_v58 = vcombine.high %v644_v53, %v660_v54  ;;  %v670_v2 = vcombine.low %v651_v60, %v667_v61  ;;  %v671_v7 = vcombine.high %v651_v60, %v667_v61 }
 0x261   : > { %v672_v59 = vmul.f32 0.35355338, %v668_v57  ;;  %v673_v1 = vmul.f32 0.35355338, %v669_v58  ;;  %v674_v4 = vmul.f32 0.35355338, %v670_v2 }
 0x262   : > { %v675_v16 = vmul.f32 0.35355338, %v671_v7 }
 0x263   : > { %5302 = vmatmul.mubr.msk.f32.vlgmr.msra.gmra.mrb[0].mxu1 %vm986_vm3, %v672_v59 }
 0x264   : > { %5305 = vmatpush3.xpose.msk.msra.mxu1 %vm986_vm3, %v828_v62  ;;  %5306 = vmatprep.mubr.msk.f32.mxu1 %vm5782_vm1, %v5783_v8 }
 0x265   : > { %5309 = vmatprep.subr.mxu1 %v5783_v8 }
 0x267   : > { %5307 = vmatmul.mubr.msk.f32.vlgmr.msra.gmra.mrb[2].mxu1 %vm986_vm3, %v673_v1 }
 0x268   : > { %5310 = vmatpush3.xpose.msk.msra.mxu1 %vm986_vm3, %v829_v3  ;;  %5311 = vmatprep.mubr.msk.f32.mxu1 %vm5782_vm1, %v5783_v8 }
 0x269   : > { %5314 = vmatprep.subr.mxu1 %v5783_v8 }
 0x26b   : > { %5312 = vmatmul.mubr.msk.f32.vlgmr.msra.gmra.mrb[4].mxu1 %vm986_vm3, %v674_v4 }
 0x26c   : > { %5315 = vmatpush3.xpose.msk.msra.mxu1 %vm986_vm3, %v830_v14  ;;  %5316 = vmatprep.mubr.msk.f32.mxu1 %vm5782_vm1, %v5783_v8 }
 0x26d   : > { %5324 = vmatprep.subr.mxu1 %v5783_v8 }
 0x26f   : > { %5317 = vmatmul.mubr.msk.f32.vlgmr.msra.gmra.mrb[6].mxu1 %vm986_vm3, %v675_v16 }
 0x270   : > { %5326 = vmatprep.mubr.msk.f32.mxu1 %vm5782_vm1, %v5783_v8 }
 0x336   : > { %v1059_v17 = vpop.f32.mrb[0].mxu1 }
 0x337   : > { %v5303_v19 = vpop.f32.mrb[1].mxu1  ;;  %v1291_v20 = vsel %vm986_vm3, %v1059_v17, -inf }
 0x338   : > { %1292 = vmax.xlane.f32.xlu1 %v1291_v20 }
 0x33a   : > { %v1135_v21 = vpop.f32.mrb[2].mxu1 }
 0x33b   : > { %v5308_v22 = vpop.f32.mrb[3].mxu1  ;;  %v1294_v23 = vsel %vm986_vm3, %v1135_v21, -inf }
 0x33c   : > { %1295 = vmax.xlane.f32.xlu0 %v1294_v23 }
 0x33e   : > { %v1211_v24 = vpop.f32.mrb[4].mxu1 }
 0x33f   : > { %v5313_v25 = vpop.f32.mrb[5].mxu1  ;;  %v1297_v27 = vsel %vm986_vm3, %v1211_v24, -inf }
 0x340   : > { %1298 = vmax.xlane.f32.xlu0 %v1297_v27 }
 0x342   : > { %v1287_v28 = vpop.f32.mrb[6].mxu1 }
 0x343   : > { %v5318_v29 = vpop.f32.mrb[7].mxu1  ;;  %v1300_v32 = vsel %vm986_vm3, %v1287_v28, -inf }
 0x349   : > { %834 = vrot.lane.b32.xlu1 %v516_v31, %s5788_s16 }
 0x34d   : > { %836 = vrot.lane.b32.xlu1 %v516_v31, %s5786_s8 }
 0x356   : > { %832 = vrot.lane.b32.xlu0 %v516_v31, %s5787_s12 }
 0x371   : > { %1301 = vmax.xlane.f32.xlu1 %v1300_v32 }
 0x382   : > { %838 = vrot.lane.b32.xlu1 %v516_v31, %s5785_s20 }
 0x3c5   : > { %v1293_v33 = vpop.xlane.xlu1 %1292 }
 0x3c6   : > { %v1303_v34 = vsub.f32 %v1059_v17, %v1293_v33 }
 0x3c8   : > { %v1307_v35 = vmul.f32 1.442695, %v1303_v34 }
 0x3c9   : > { %v1296_v36 = vpop.xlane.xlu0 %1295  ;;  %v835_v49 = vpop.permute.xlu1 %834 }
 0x3ca   : > { %5574 = vpow2.f32 %v1307_v35  ;;  %v1304_v37 = vsub.f32 %v1135_v21, %v1296_v36 }
 0x3cc   : > { %v1309_v38 = vmul.f32 1.442695, %v1304_v37 }
 0x3cd   : > { %v1299_v39 = vpop.xlane.xlu0 %1298  ;;  %v837_v50 = vpop.permute.xlu1 %836 }
 0x3ce   : > { %5576 = vpow2.f32 %v1309_v38  ;;  %v1305_v18 = vsub.f32 %v1211_v24, %v1299_v39 }
 0x3d0   : > { %v1311_v41 = vmul.f32 1.442695, %v1305_v18 }
 0x3d1   : > { %v833_v56 = vpop.permute.xlu0 %832 }
 0x3d2   : > { %5578 = vpow2.f32 %v1311_v41 }
 0x3d4   : > { %v6172_v42 = vpop.eup %5574 }
 0x3d5   : > { %v1315_v43 = vsel %vm986_vm3, %v6172_v42, 0.0 }
 0x3d6   : > { %1316 = vadd.xlane.f32.xlu0 %v1315_v43 }
 0x3d8   : > { %v6176_v44 = vpop.eup %5576 }
 0x3d9   : > { %v1318_v45 = vsel %vm986_vm3, %v6176_v44, 0.0 }
 0x3da   : > { %1319 = vadd.xlane.f32.xlu1 %v1318_v45 }
 0x3dc   : > { %v6180_v46 = vpop.eup %5578 }
 0x3dd   : > { %v1321_v48 = vsel %vm986_vm3, %v6180_v46, 0.0 }
 0x3de   : > { %1322 = vadd.xlane.f32.xlu0 %v1321_v48 }
 0x3eb   : > { %842 = vrot.lane.b32.xlu1 %v835_v49, %s5785_s20 }
 0x3ef   : > { %844 = vrot.lane.b32.xlu1 %v837_v50, %s5785_s20 }
 0x3fe   : > { %v1302_v51 = vpop.xlane.xlu1 %1301 }
 0x3ff   : > { %v1306_v52 = vsub.f32 %v1287_v28, %v1302_v51 }
 0x401   : > { %v1313_v53 = vmul.f32 1.442695, %v1306_v52 }
 0x402   : > { %v839_v57 = vpop.permute.xlu1 %838 }
 0x403   : > { %5580 = vpow2.f32 %v1313_v53 }
 0x40d   : > { %v6186_v54 = vpop.eup %5580 }
 0x40e   : > { %v1324_v55 = vsel %vm986_vm3, %v6186_v54, 0.0 }
 0x40f   : > { %1325 = vadd.xlane.f32.xlu0 %v1324_v55 }
 0x425   : > { %840 = vrot.lane.b32.xlu0 %v833_v56, %s5785_s20 }
 0x463   : > { %v1317_v58 = vpop.xlane.xlu0 %1316 }
 0x464   : > { %5582 = vrcp.f32 %v1317_v58 }
 0x467   : > { %v1320_v59 = vpop.xlane.xlu1 %1319 }
 0x468   : > { %5584 = vrcp.f32 %v1320_v59 }
 0x46b   : > { %v1323_v60 = vpop.xlane.xlu0 %1322  ;;  %v843_v61 = vpop.permute.xlu1 %842 }
 0x46c   : > { %v850_v63 = vcombine.low %v839_v57, %v843_v61  ;;  %v851_v0 = vcombine.high %v839_v57, %v843_v61  ;;  %5586 = vrcp.f32 %v1323_v60 }
 0x46e   : > { %v858_v7 = vrot.slane %v850_v63, %v6106_v40  ;;  %v865_v14 = vrot.slane %v851_v0, %v6106_v40  ;;  %v5583_v36 = vpop.eup %5582 }
 0x46f   : > { %v845_v1 = vpop.permute.xlu1 %844  ;;  %v1328_v55 = vmul.f32 %v5583_v36, %v6172_v42 }
 0x472   : > { %v5585_v41 = vpop.eup %5584 }
 0x473   : > { %v1330_v56 = vmul.f32 %v5585_v41, %v6176_v44 }
 0x476   : > { %v5587_v48 = vpop.eup %5586 }
 0x477   : > { %v1332_v59 = vmul.f32 %v5587_v48, %v6180_v46 }
 0x49c   : > { %v1326_v62 = vpop.xlane.xlu0 %1325 }
 0x49d   : > { %5588 = vrcp.f32 %v1326_v62 }
 0x4a0   : > { %v841_v2 = vpop.permute.xlu0 %840 }
 0x4a1   : > { %v866_v3 = vcombine.low %v841_v2, %v845_v1  ;;  %v867_v4 = vcombine.high %v841_v2, %v845_v1 }
 0x4a3   : > { %v874_v16 = vrot.slane %v866_v3, %v6106_v40  ;;  %v881_v17 = vrot.slane %v867_v4, %v6106_v40 }
 0x4a5   : > { %v882_v19 = vcombine.low %v858_v7, %v874_v16  ;;  %v883_v20 = vcombine.high %v858_v7, %v874_v16  ;;  %v898_v21 = vcombine.low %v865_v14, %v881_v17  ;;  %v899_v22 = vcombine.high %v865_v14, %v881_v17 }
 0x4a7   : > { %v890_v23 = vrot.slane %v882_v19, %v6109_v47  ;;  %v897_v24 = vrot.slane %v883_v20, %v6109_v47  ;;  %v906_v25 = vrot.slane %v898_v21, %v6109_v47  ;;  %v913_v27 = vrot.slane %v899_v22, %v6109_v47  ;;  %v5589_v53 = vpop.eup %5588 }
 0x4a8   : > { %v1334_v60 = vmul.f32 %v5589_v53, %v6186_v54 }
 0x4a9   : > { %v918_v28 = vcombine.low %v890_v23, %v897_v24  ;;  %v5088_v29 = vcombine.high %v890_v23, %v897_v24  ;;  %v934_v30 = vcombine.low %v906_v25, %v913_v27  ;;  %v5089_v31 = vcombine.high %v906_v25, %v913_v27 }
 0x4ab   : > { %v925_v32 = vrot.slane %v918_v28, %v6106_v40  ;;  %v933_v33 = vrot.slane %v5088_v29, %v6106_v40  ;;  %v941_v34 = vrot.slane %v934_v30, %v6106_v40  ;;  %v949_v35 = vrot.slane %v5089_v31, %v6106_v40 }
 0x4ad   : > { %v950_v37 = vcombine.low %v925_v32, %v933_v33  ;;  %v966_v38 = vcombine.low %v941_v34, %v949_v35  ;;  %v951_v39 = vcombine.high %v925_v32, %v933_v33  ;;  %v967_v18 = vcombine.high %v941_v34, %v949_v35 }
 0x4af   : > { %v958_v43 = vrot.slane %v950_v37, %v6109_v47  ;;  %v974_v45 = vrot.slane %v966_v38, %v6109_v47  ;;  %v965_v49 = vrot.slane %v951_v39, %v6109_v47  ;;  %v981_v50 = vrot.slane %v967_v18, %v6109_v47 }
 0x4b1   : > { %v982_v51 = vcombine.low %v958_v43, %v974_v45  ;;  %v983_v52 = vcombine.high %v958_v43, %v974_v45  ;;  %v984_v57 = vcombine.low %v965_v49, %v981_v50  ;;  %v985_v58 = vcombine.high %v965_v49, %v981_v50 }
 0x4b3   : > { %5320 = vmatpush3.msra.mxu0 %v982_v51  ;;  %5325 = vmatpush3.msra.mxu1 %v983_v52 }
 0x4b4   : > { %5322 = vmatmul.mubr.msk.f32.vlgmr.msra.gmra.mrb[2].mxu0 %vm986_vm3, %v1328_v55  ;;  %5327 = vmatmul.mubr.msk.f32.vlgmr.msra.gmra.mrb[8].mxu1 %vm986_vm3, %v1330_v56 }
 0x4b5   : > { %5329 = vmatprep.subr.mxu0 %v5783_v8  ;;  %5334 = vmatprep.subr.mxu1 %v5783_v8 }
 0x4b6   : > { %5330 = vmatpush3.msra.mxu0 %v984_v57  ;;  %5335 = vmatpush3.msra.mxu1 %v985_v58  ;;  %v6254_v57 = vsub.s32 3, %v6049_v9 }
 0x4b7   : > { %5331 = vmatprep.mubr.msk.f32.mxu0 %vm5782_vm1, %v5783_v8  ;;  %5336 = vmatprep.mubr.msk.f32.mxu1 %vm5782_vm1, %v5783_v8 }
 0x4b8   : > { %5332 = vmatmul.mubr.msk.f32.vlgmr.msra.gmra.mrb[4].mxu0 %vm986_vm3, %v1332_v59  ;;  %5337 = vmatmul.mubr.msk.f32.vlgmr.msra.gmra.mrb[10].mxu1 %vm986_vm3, %v1334_v60  ;;  %v1783_v58 = vrot.slane %v6058_v11, %v6254_v57 }
 0x4b9   : > { %5445 = vmatprep.subr.bf16.mxu0 %v5781_v5  ;;  %5347 = vmatprep.mubr.msk.f32.mxu0 %vm5782_vm1, %v5783_v8 }
 0x4ba   : > { %5447 = vmatpush3.bf16.msra.mxu0 %v6044_v6  ;;  %5451 = vmatprep.subr.bf16.mxu1 %v5781_v5 }
 0x4bb   : > { %5448 = vmatprep.subr.bf16.mxu0 %v5781_v5  ;;  %5358 = vmatprep.mubr.msk.f32.mxu1 %vm5782_vm1, %v5783_v8 }
 0x4be   : > { %5450 = vmatpush3.bf16.msra.mxu0 %v6055_v10 }
 0x587   : > { %v1404_v42 = vpop.f32.mrb[2].mxu0  ;;  %v1477_v44 = vpop.f32.mrb[8].mxu1 }
 0x588   : > { %v5323_v46 = vpop.f32.mrb[3].mxu0  ;;  %v5328_v54 = vpop.f32.mrb[9].mxu1 }
 0x589   : > { %v5105_v54 = vld [vmem:[%s6009_s17 + $0x20] sm:$0xff] }
 0x58b   : > { %v1550_v61 = vpop.f32.mrb[4].mxu0  ;;  %v1623_v62 = vpop.f32.mrb[10].mxu1 }
 0x58c   : > { %v1627_v63 = vcombine.low %v1404_v42, %v1550_v61  ;;  %v1628_v0 = vcombine.high %v1404_v42, %v1550_v61  ;;  %v1643_v1 = vcombine.low %v1477_v44, %v1623_v62  ;;  %v1644_v2 = vcombine.high %v1477_v44, %v1623_v62  ;;  %v5333_v6 = vpop.f32.mrb[5].mxu0  ;;  %v5338_v3 = vpop.f32.mrb[11].mxu1  ;;  %v5106_v61 = vld [vmem:[%s6009_s17 + $0x28] sm:$0xff]  ;;  %v5107_v62 = vld [vmem:[%s6009_s17 + $0x30] sm:$0xff] }
 0x58e   : > { %v1635_v4 = vrot.slane %v1627_v63, %v6106_v40  ;;  %v1642_v7 = vrot.slane %v1628_v0, %v6106_v40  ;;  %v1651_v14 = vrot.slane %v1643_v1, %v6106_v40  ;;  %v1658_v10 = vrot.slane %v1644_v2, %v6106_v40  ;;  %v5108_v0 = vld [vmem:[%s6009_s17 + $0x38] sm:$0xff] }
 0x58f   : > { %v6263_v63 = vpack.c.bf16 %v5106_v61, %v5105_v54  ;;  %v408_v1 = vld [vmem:[%s6744_s1] sm:$0xff]  ;;  %v6269_v2 = vpack.c.bf16 %v5108_v0, %v5107_v62 }
 0x590   : > { %v1659_v16 = vcombine.low %v1635_v4, %v1651_v14  ;;  %v1660_v17 = vcombine.high %v1635_v4, %v1651_v14  ;;  %v1675_v19 = vcombine.low %v1642_v7, %v1658_v10  ;;  %v1676_v20 = vcombine.high %v1642_v7, %v1658_v10 }
 0x591   : > { %5458 = vmatprep.subr.bf16.mxu0 %v6263_v63  ;;  %5453 = vmatpush3.bf16.msra.mxu1 %v6263_v63  ;;  %v6289_v10 = vsub.s32 5, %v6049_v9 }
 0x592   : > { %v1667_v21 = vrot.slane %v1659_v16, %v6109_v47  ;;  %v1674_v22 = vrot.slane %v1660_v17, %v6109_v47  ;;  %v1683_v23 = vrot.slane %v1675_v19, %v6109_v47  ;;  %v1690_v24 = vrot.slane %v1676_v20, %v6109_v47  ;;  %5454 = vmatprep.subr.bf16.mxu1 %v5781_v5 }
 0x593   : > { %v2053_v16 = vrot.slane %v6058_v11, %v6289_v10  ;;  %v6295_v17 = vsub.s32 4, %v6049_v9 }
 0x594   : > { %v1695_v25 = vcombine.low %v1667_v21, %v1674_v22  ;;  %v5102_v27 = vcombine.high %v1667_v21, %v1674_v22  ;;  %v1711_v28 = vcombine.low %v1683_v23, %v1690_v24  ;;  %v5103_v29 = vcombine.high %v1683_v23, %v1690_v24 }
 0x595   : > { %5456 = vmatpush3.bf16.msra.mxu1 %v6269_v2  ;;  %v2044_v19 = vrot.slane %v6058_v11, %v6295_v17 }
 0x596   : > { %v1702_v30 = vrot.slane %v1695_v25, %v6106_v40  ;;  %v1710_v31 = vrot.slane %v5102_v27, %v6106_v40  ;;  %v1718_v32 = vrot.slane %v1711_v28, %v6106_v40  ;;  %v1726_v33 = vrot.slane %v5103_v29, %v6106_v40  ;;  %5465 = vmatprep.subr.bf16.mxu1 %v5781_v5  ;;  %v6309_v29 = vld [vmem:[%s6032_s14 + $0x8] sm:$0x7f] }
 0x598   : > { %v1728_v34 = vcombine.high %v1702_v30, %v1710_v31  ;;  %v1744_v35 = vcombine.high %v1718_v32, %v1726_v33  ;;  %v1727_v36 = vcombine.low %v1702_v30, %v1710_v31  ;;  %v1743_v37 = vcombine.low %v1718_v32, %v1726_v33 }
 0x599   : > { %v1875_v30 = vrot.slane %v6309_v29, %v6062_v12  ;;  %v1880_v33 = vrot.slane %v6309_v29, %v6097_v26 }
 0x59a   : > { %v1742_v38 = vrot.slane %v1728_v34, %v6109_v47  ;;  %v1758_v39 = vrot.slane %v1744_v35, %v6109_v47  ;;  %v1735_v18 = vrot.slane %v1727_v36, %v6109_v47  ;;  %v1751_v41 = vrot.slane %v1743_v37, %v6109_v47 }
 0x59c   : > { %v1761_v43 = vcombine.low %v1742_v38, %v1758_v39  ;;  %v1760_v45 = vcombine.high %v1735_v18, %v1751_v41  ;;  %v1762_v48 = vcombine.high %v1742_v38, %v1758_v39  ;;  %v1759_v49 = vcombine.low %v1735_v18, %v1751_v41 }
 0x59e   : > { %1768 = vrot.lane.b32.xlu1 %v1761_v43, %s5792_s3  ;;  %1764 = vrot.lane.b32.xlu0 %v1760_v45, %s5793_s24 }
 0x5a2   : > { %1772 = vrot.lane.b32.xlu0 %v1762_v48, %s5794_s27 }
 0x610   : > { %v1765_v50 = vpop.permute.xlu0 %1764  ;;  %v1769_v51 = vpop.permute.xlu1 %1768 }
 0x611   : > { %v1775_v52 = vsel %vm986_vm3, %v1759_v49, %v1765_v50  ;;  %v6338_v50 = vsub.s32 6, %v6049_v9 }
 0x612   : > { %v1777_v55 = vsel %vm1776_vm4, %v1775_v52, %v1769_v51 }
 0x614   : > { %v1773_v53 = vpop.permute.xlu0 %1772 }
 0x615   : > { %v1779_v56 = vsel %vm1778_vm5, %v1777_v55, %v1773_v53  ;;  %v2063_v53 = vrot.slane %v6058_v11, %v6338_v50 }
 0x616   : > { %5348 = vmatmul.mubr.msk.f32.vlgmr.msra.gmra.mrb[6].mxu0 %vm416_vm2, %v1779_v56 }
 0x617   : > { %5369 = vmatprep.mubr.msk.f32.mxu0 %vm416_vm2, %v408_v1  ;;  %5460 = vmatpush3.bf16.msra.mxu0 %v6263_v63 }
 0x618   : > { %5462 = vmatprep.subr.bf16.mxu0 %v6269_v2 }
 0x61b   : > { %5464 = vmatpush3.bf16.msra.mxu0 %v6269_v2 }
 0x61c   : > { %5469 = vmatprep.subr.bf16.mxu0 %v5781_v5 }
 0x6e9   : > { %v1853_v59 = vpop.f32.mrb[6].mxu0 }
 0x6ea   : > { %v1854_v60 = vadd.f32 %v1853_v59, %v1783_v58  ;;  %v5349_v42 = vpop.f32.mrb[7].mxu0 }
 0x6ec   : > { %v1857_v44 = vadd.f32 %v1854_v60, %v6070_v15  ;;  %v409_v15 = vld [vmem:[%s6744_s1 + $0x8] sm:$0xff] }
 0x6ed   : > { %5370 = vmatmul.mubr.msk.f32.vlgmr.msra.gmra.mrb[8].mxu0 %vm416_vm2, %v409_v15 }
 0x6ee   : > { %v1858_v46 = vsel %vm416_vm2, %v1857_v44, 0.0  ;;  %5383 = vmatprep.mubr.msk.f32.mxu0 %vm5782_vm1, %v5783_v8 }
 0x6ef   : > { %1859 = vadd.xlane.f32.xlu1 %v1858_v46 }
 0x700   : > { %2046 = vrot.lane.b32.xlu1 %v2044_v19, %s5785_s20 }
 0x77c   : > { %v1860_v6 = vpop.xlane.xlu1 %1859 }
 0x77d   : > { %v1862_v3 = vmul.f32 0.03125, %v1860_v6 }
 0x77f   : > { %v1863_v4 = vsub.f32 %v1857_v44, %v1862_v3 }
 0x780   : > { %v2047_v36 = vpop.permute.xlu1 %2046 }
 0x781   : > { %v1864_v7 = vmul.f32 %v1863_v4, %v1863_v4 }
 0x783   : > { %v1865_v14 = vsel %vm416_vm2, %v1864_v7, 0.0 }
 0x784   : > { %1866 = vadd.xlane.f32.xlu0 %v1865_v14 }
 0x79a   : > { %2055 = vrot.lane.b32.xlu0 %v2053_v16, %s5784_s23 }
 0x7c0   : > { %v6300_v20 = vpop.f32.mrb[8].mxu0 }
 0x7c1   : > { %v6302_v21 = vpop.f32.mrb[9].mxu0 }
 0x811   : > { %v1867_v22 = vpop.xlane.xlu0 %1866 }
 0x812   : > { %v1868_v23 = vmul.f32 0.03125, %v1867_v22 }
 0x814   : > { %v1869_v24 = vadd.f32 1e-05, %v1868_v23 }
 0x815   : > { %v2056_v25 = vpop.permute.xlu0 %2055 }
 0x816   : > { %5590 = vrsqrt.f32 %v1869_v24  ;;  %v2059_v27 = vadd.f32 %v6300_v20, %v2056_v25  ;;  %v2058_v28 = vadd.f32 %v2056_v25, %v6302_v21 }
 0x818   : > { %2231 = vrot.lane.b32.xlu1 %v2058_v28, %s5787_s12  ;;  %2233 = vrot.lane.b32.xlu0 %v2059_v27, %s5787_s12 }
 0x81c   : > { %2235 = vrot.lane.b32.xlu1 %v2058_v28, %s5788_s16  ;;  %2237 = vrot.lane.b32.xlu0 %v2059_v27, %s5788_s16 }
 0x820   : > { %v5591_v31 = vpop.eup %5590  ;;  %2239 = vrot.lane.b32.xlu1 %v2058_v28, %s5786_s8  ;;  %2241 = vrot.lane.b32.xlu0 %v2059_v27, %s5786_s8 }
 0x821   : > { %v1871_v32 = vmul.f32 %v5591_v31, %v1863_v4 }
 0x823   : > { %v1876_v34 = vmul.f32 %v1875_v30, %v1871_v32 }
 0x825   : > { %v6319_v35 = vadd.f32 %v1880_v33, %v1876_v34 }
 0x827   : > { %5359 = vmatmul.mubr.msk.f32.vlgmr.msra.gmra.mrb[12].mxu1 %vm416_vm2, %v6319_v35 }
 0x828   : > { %5376 = vmatprep.mubr.msk.f32.mxu1 %vm5782_vm1, %v5783_v8 }
 0x88a   : > { %v2232_v18 = vpop.permute.xlu1 %2231  ;;  %v2234_v41 = vpop.permute.xlu0 %2233 }
 0x88e   : > { %v2236_v43 = vpop.permute.xlu1 %2235  ;;  %v2238_v45 = vpop.permute.xlu0 %2237 }
 0x892   : > { %v2240_v48 = vpop.permute.xlu1 %2239  ;;  %v2242_v49 = vpop.permute.xlu0 %2241 }
 0x8fa   : > { %v1956_v37 = vpop.f32.mrb[12].mxu1 }
 0x8fb   : > { %v2049_v38 = vadd.f32 %v2047_v36, %v1956_v37  ;;  %v5360_v39 = vpop.f32.mrb[13].mxu1 }
 0x8fd   : > { %2073 = vrot.lane.b32.xlu0 %v2049_v38, %s5788_s16  ;;  %2071 = vrot.lane.b32.xlu1 %v2049_v38, %s5787_s12 }
 0x901   : > { %2243 = vrot.lane.b32.xlu0 %v2058_v28, %s5784_s23  ;;  %2075 = vrot.lane.b32.xlu1 %v2049_v38, %s5786_s8 }
 0x905   : > { %2245 = vrot.lane.b32.xlu1 %v2059_v27, %s5784_s23  ;;  %2247 = vrot.lane.b32.xlu0 %v2232_v18, %s5784_s23 }
 0x909   : > { %2249 = vrot.lane.b32.xlu1 %v2234_v41, %s5784_s23  ;;  %2251 = vrot.lane.b32.xlu0 %v2236_v43, %s5784_s23 }
 0x90d   : > { %2253 = vrot.lane.b32.xlu1 %v2238_v45, %s5784_s23  ;;  %2255 = vrot.lane.b32.xlu0 %v2240_v48, %s5784_s23 }
 0x911   : > { %2257 = vrot.lane.b32.xlu1 %v2242_v49, %s5784_s23  ;;  %2077 = vrot.lane.b32.xlu0 %v2049_v38, %s5789_s21 }
 0x96f   : > { %v2074_v51 = vpop.permute.xlu0 %2073  ;;  %v2072_v52 = vpop.permute.xlu1 %2071 }
 0x970   : > { %2081 = vrot.lane.b32.xlu0 %v2074_v51, %s5789_s21  ;;  %2079 = vrot.lane.b32.xlu1 %v2072_v52, %s5789_s21 }
 0x973   : > { %v2244_v55 = vpop.permute.xlu0 %2243  ;;  %v2076_v56 = vpop.permute.xlu1 %2075 }
 0x974   : > { %2065 = vrot.lane.b32.xlu0 %v2063_v53, %s5789_s21  ;;  %2083 = vrot.lane.b32.xlu1 %v2076_v56, %s5789_s21 }
 0x977   : > { %v2248_v58 = vpop.permute.xlu0 %2247  ;;  %v2246_v59 = vpop.permute.xlu1 %2245 }
 0x97b   : > { %v2252_v60 = vpop.permute.xlu0 %2251  ;;  %v2250_v42 = vpop.permute.xlu1 %2249 }
 0x97c   : > { %v2267_v44 = vcombine.low %v2244_v55, %v2252_v60  ;;  %v2268_v46 = vcombine.high %v2244_v55, %v2252_v60 }
 0x97e   : > { %v2275_v1 = vrot.slane %v2267_v44, %v6106_v40  ;;  %v2282_v11 = vrot.slane %v2268_v46, %v6106_v40 }
 0x97f   : > { %v2256_v54 = vpop.permute.xlu0 %2255  ;;  %v2254_v61 = vpop.permute.xlu1 %2253 }
 0x980   : > { %v2283_v62 = vcombine.low %v2248_v58, %v2256_v54  ;;  %v2284_v0 = vcombine.high %v2248_v58, %v2256_v54  ;;  %v2335_v3 = vcombine.low %v2246_v59, %v2254_v61  ;;  %v2336_v4 = vcombine.high %v2246_v59, %v2254_v61 }
 0x982   : > { %v2291_v15 = vrot.slane %v2283_v62, %v6106_v40  ;;  %v2298_v6 = vrot.slane %v2284_v0, %v6106_v40  ;;  %v2343_v31 = vrot.slane %v2335_v3, %v6106_v40  ;;  %v2350_v32 = vrot.slane %v2336_v4, %v6106_v40 }
 0x983   : > { %v2258_v7 = vpop.permute.xlu1 %2257 }
 0x984   : > { %v2299_v14 = vcombine.low %v2275_v1, %v2291_v15  ;;  %v2300_v16 = vcombine.high %v2275_v1, %v2291_v15  ;;  %v2315_v19 = vcombine.low %v2282_v11, %v2298_v6  ;;  %v2316_v22 = vcombine.high %v2282_v11, %v2298_v6 }
 0x985   : > { %v2351_v23 = vcombine.low %v2250_v42, %v2258_v7  ;;  %v2352_v24 = vcombine.high %v2250_v42, %v2258_v7 }
 0x986   : > { %v2307_v25 = vrot.slane %v2299_v14, %v6109_v47  ;;  %v2314_v27 = vrot.slane %v2300_v16, %v6109_v47  ;;  %v2323_v28 = vrot.slane %v2315_v19, %v6109_v47  ;;  %v2330_v30 = vrot.slane %v2316_v22, %v6109_v47 }
 0x987   : > { %v2359_v33 = vrot.slane %v2351_v23, %v6106_v40  ;;  %v2366_v34 = vrot.slane %v2352_v24, %v6106_v40 }
 0x988   : > { %v2403_v36 = vcombine.low %v2307_v25, %v2314_v27  ;;  %v5114_v37 = vcombine.high %v2307_v25, %v2314_v27  ;;  %v2419_v38 = vcombine.low %v2323_v28, %v2330_v30  ;;  %v5115_v39 = vcombine.high %v2323_v28, %v2330_v30 }
 0x989   : > { %v2367_v18 = vcombine.low %v2343_v31, %v2359_v33  ;;  %v2368_v41 = vcombine.high %v2343_v31, %v2359_v33  ;;  %v2383_v43 = vcombine.low %v2350_v32, %v2366_v34  ;;  %v2384_v45 = vcombine.high %v2350_v32, %v2366_v34 }
 0x98a   : > { %v2410_v48 = vrot.slane %v2403_v36, %v6106_v40  ;;  %v2418_v49 = vrot.slane %v5114_v37, %v6106_v40  ;;  %v2426_v51 = vrot.slane %v2419_v38, %v6106_v40  ;;  %v2434_v52 = vrot.slane %v5115_v39, %v6106_v40 }
 0x98b   : > { %v2375_v53 = vrot.slane %v2367_v18, %v6109_v47  ;;  %v2382_v55 = vrot.slane %v2368_v41, %v6109_v47  ;;  %v2391_v56 = vrot.slane %v2383_v43, %v6109_v47  ;;  %v2398_v58 = vrot.slane %v2384_v45, %v6109_v47  ;;  %v2078_v45 = vpop.permute.xlu0 %2077 }
 0x98c   : > { %v2435_v59 = vcombine.low %v2410_v48, %v2418_v49  ;;  %v2436_v60 = vcombine.high %v2410_v48, %v2418_v49  ;;  %v2451_v42 = vcombine.low %v2426_v51, %v2434_v52  ;;  %v2452_v44 = vcombine.high %v2426_v51, %v2434_v52 }
 0x98d   : > { %v2471_v46 = vcombine.low %v2375_v53, %v2382_v55  ;;  %v5116_v54 = vcombine.high %v2375_v53, %v2382_v55  ;;  %v2487_v61 = vcombine.low %v2391_v56, %v2398_v58  ;;  %v5117_v62 = vcombine.high %v2391_v56, %v2398_v58 }
 0x98e   : > { %v2450_v0 = vrot.slane %v2436_v60, %v6109_v47  ;;  %v2466_v1 = vrot.slane %v2452_v44, %v6109_v47  ;;  %v2443_v4 = vrot.slane %v2435_v59, %v6109_v47  ;;  %v2459_v7 = vrot.slane %v2451_v42, %v6109_v47 }
 0x98f   : > { %v2478_v11 = vrot.slane %v2471_v46, %v6106_v40  ;;  %v2486_v15 = vrot.slane %v5116_v54, %v6106_v40  ;;  %v2494_v6 = vrot.slane %v2487_v61, %v6106_v40  ;;  %v2502_v3 = vrot.slane %v5117_v62, %v6106_v40 }
 0x990   : > { %v2469_v14 = vcombine.low %v2450_v0, %v2466_v1  ;;  %v2470_v16 = vcombine.high %v2450_v0, %v2466_v1  ;;  %v2467_v31 = vcombine.low %v2443_v4, %v2459_v7  ;;  %v2468_v32 = vcombine.high %v2443_v4, %v2459_v7 }
 0x991   : > { %v2503_v19 = vcombine.low %v2478_v11, %v2486_v15  ;;  %v2504_v22 = vcombine.high %v2478_v11, %v2486_v15  ;;  %v2519_v23 = vcombine.low %v2494_v6, %v2502_v3  ;;  %v2520_v24 = vcombine.high %v2494_v6, %v2502_v3 }
 0x993   : > { %v2511_v25 = vrot.slane %v2503_v19, %v6109_v47  ;;  %v2518_v27 = vrot.slane %v2504_v22, %v6109_v47  ;;  %v2527_v28 = vrot.slane %v2519_v23, %v6109_v47  ;;  %v2534_v30 = vrot.slane %v2520_v24, %v6109_v47 }
 0x995   : > { %v2535_v33 = vcombine.low %v2511_v25, %v2527_v28  ;;  %v2536_v34 = vcombine.high %v2511_v25, %v2527_v28  ;;  %v2537_v36 = vcombine.low %v2518_v27, %v2534_v30  ;;  %v2538_v37 = vcombine.high %v2518_v27, %v2534_v30 }
 0x997   : > { %v5466_v39 = vpack.c.bf16 %v2535_v33, %v2467_v31  ;;  %v5470_v18 = vpack.c.bf16 %v2536_v34, %v2468_v32  ;;  %v5474_v41 = vpack.c.bf16 %v2537_v36, %v2469_v14  ;;  %v5478_v43 = vpack.c.bf16 %v2538_v37, %v2470_v16 }
 0x999   : > { %5468 = vmatpush3.bf16.xpose.msk.msra.mxu1 %vm6380_vm6, %v5466_v39  ;;  %5472 = vmatpush3.bf16.xpose.msk.msra.mxu0 %vm6380_vm6, %v5470_v18 }
 0x99a   : > { %5473 = vmatprep.subr.bf16.mxu1 %v5781_v5  ;;  %5477 = vmatprep.subr.bf16.mxu0 %v5781_v5 }
 0x9e2   : > { %v2082_v48 = vpop.permute.xlu0 %2081  ;;  %v2080_v49 = vpop.permute.xlu1 %2079 }
 0x9e3   : > { %v2089_v51 = vcombine.low %v2078_v45, %v2082_v48  ;;  %v2090_v52 = vcombine.high %v2078_v45, %v2082_v48 }
 0x9e5   : > { %v2097_v42 = vrot.slane %v2089_v51, %v6106_v40  ;;  %v2104_v44 = vrot.slane %v2090_v52, %v6106_v40 }
 0x9e6   : > { %v2066_v53 = vpop.permute.xlu0 %2065  ;;  %v2084_v55 = vpop.permute.xlu1 %2083 }
 0x9e7   : > { %v6391_v56 = vadd.f32 %v2066_v53, %v6302_v21  ;;  %v6394_v58 = vadd.f32 %v6300_v20, %v2066_v53  ;;  %v2105_v59 = vcombine.low %v2080_v49, %v2084_v55  ;;  %v2106_v60 = vcombine.high %v2080_v49, %v2084_v55 }
 0x9e9   : > { %v2113_v46 = vrot.slane %v2105_v59, %v6106_v40  ;;  %v2120_v54 = vrot.slane %v2106_v60, %v6106_v40  ;;  %2541 = vrot.lane.b32.xlu0 %v6391_v56, %s5787_s12  ;;  %2543 = vrot.lane.b32.xlu1 %v6394_v58, %s5787_s12 }
 0x9eb   : > { %v2121_v21 = vcombine.low %v2097_v42, %v2113_v46  ;;  %v2122_v61 = vcombine.high %v2097_v42, %v2113_v46  ;;  %v2137_v20 = vcombine.low %v2104_v44, %v2120_v54  ;;  %v2138_v62 = vcombine.high %v2104_v44, %v2120_v54 }
 0x9ed   : > { %v2129_v0 = vrot.slane %v2121_v21, %v6109_v47  ;;  %v2136_v1 = vrot.slane %v2122_v61, %v6109_v47  ;;  %v2145_v11 = vrot.slane %v2137_v20, %v6109_v47  ;;  %v2152_v15 = vrot.slane %v2138_v62, %v6109_v47  ;;  %2547 = vrot.lane.b32.xlu0 %v6394_v58, %s5788_s16 }
 0x9ee   : > { %2545 = vrot.lane.b32.xlu1 %v6391_v56, %s5788_s16 }
 0x9ef   : > { %v2157_v6 = vcombine.low %v2129_v0, %v2136_v1  ;;  %v5112_v3 = vcombine.high %v2129_v0, %v2136_v1  ;;  %v2173_v4 = vcombine.low %v2145_v11, %v2152_v15  ;;  %v5113_v7 = vcombine.high %v2145_v11, %v2152_v15 }
 0x9f1   : > { %v2164_v14 = vrot.slane %v2157_v6, %v6106_v40  ;;  %v2172_v16 = vrot.slane %v5112_v3, %v6106_v40  ;;  %v2180_v19 = vrot.slane %v2173_v4, %v6106_v40  ;;  %v2188_v22 = vrot.slane %v5113_v7, %v6106_v40 }
 0x9f3   : > { %v2189_v23 = vcombine.low %v2164_v14, %v2172_v16  ;;  %v2205_v24 = vcombine.low %v2180_v19, %v2188_v22  ;;  %v2190_v25 = vcombine.high %v2164_v14, %v2172_v16  ;;  %v2206_v27 = vcombine.high %v2180_v19, %v2188_v22 }
 0x9f5   : > { %v2197_v28 = vrot.slane %v2189_v23, %v6109_v47  ;;  %v2213_v30 = vrot.slane %v2205_v24, %v6109_v47  ;;  %v2204_v36 = vrot.slane %v2190_v25, %v6109_v47  ;;  %v2220_v37 = vrot.slane %v2206_v27, %v6109_v47 }
 0x9f7   : > { %v2221_v31 = vcombine.low %v2197_v28, %v2213_v30  ;;  %v2222_v32 = vcombine.high %v2197_v28, %v2213_v30  ;;  %v2223_v39 = vcombine.low %v2204_v36, %v2220_v37  ;;  %v2224_v18 = vcombine.high %v2204_v36, %v2220_v37 }
 0x9f9   : > { %v2225_v33 = vmul.f32 0.35355338, %v2221_v31  ;;  %v2226_v34 = vmul.f32 0.35355338, %v2222_v32  ;;  %v2227_v45 = vmul.f32 0.35355338, %v2223_v39 }
 0x9fa   : > { %v2228_v48 = vmul.f32 0.35355338, %v2224_v18 }
 0x9fb   : > { %5377 = vmatmul.mubr.msk.f32.vlgmr.msra.gmra.mrb[14].mxu1 %vm986_vm3, %v2225_v33  ;;  %5384 = vmatmul.mubr.msk.f32.vlgmr.msra.gmra.mrb[10].mxu0 %vm986_vm3, %v2226_v34 }
 0x9fc   : > { %5476 = vmatpush3.bf16.xpose.msk.msra.mxu1 %vm6380_vm6, %v5474_v41  ;;  %5480 = vmatpush3.bf16.xpose.msk.msra.mxu0 %vm6380_vm6, %v5478_v43 }
 0x9fd   : > { %5390 = vmatprep.mubr.msk.f32.mxu1 %vm5782_vm1, %v5783_v8  ;;  %5397 = vmatprep.mubr.msk.f32.mxu0 %vm5782_vm1, %v5783_v8 }
 0x9fe   : > { %5481 = vmatprep.subr.bf16.mxu1 %v5781_v5  ;;  %5487 = vmatprep.subr.bf16.mxu0 %v5781_v5 }
 0xa03   : > { %5391 = vmatmul.mubr.msk.f32.vlgmr.msra.gmra.mrb[16].mxu1 %vm986_vm3, %v2227_v45  ;;  %5398 = vmatmul.mubr.msk.f32.vlgmr.msra.gmra.mrb[12].mxu0 %vm986_vm3, %v2228_v48 }
 0xa04   : > { %5404 = vmatprep.mubr.msk.f32.mxu1 %vm5782_vm1, %v5783_v8  ;;  %5418 = vmatprep.mubr.msk.f32.mxu0 %vm5782_vm1, %v5783_v8 }
 0xa5b   : > { %v2542_v46 = vpop.permute.xlu0 %2541  ;;  %v2544_v54 = vpop.permute.xlu1 %2543 }
 0xa5f   : > { %v2548_v61 = vpop.permute.xlu0 %2547 }
 0xa60   : > { %v2546_v21 = vpop.permute.xlu1 %2545 }
 0xace   : > { %v2924_v38 = vpop.f32.mrb[14].mxu1  ;;  %v3003_v41 = vpop.f32.mrb[10].mxu0 }
 0xacf   : > { %v5378_v43 = vpop.f32.mrb[15].mxu1  ;;  %v5385_v49 = vpop.f32.mrb[11].mxu0  ;;  %v3168_v51 = vsel %vm1776_vm4, %v3003_v41, -inf  ;;  %v3165_v52 = vsel %vm1776_vm4, %v2924_v38, -inf }
 0xad0   : > { %3169 = vmax.xlane.f32.xlu0 %v3168_v51  ;;  %3166 = vmax.xlane.f32.xlu1 %v3165_v52 }
 0xad6   : > { %v3082_v53 = vpop.f32.mrb[16].mxu1  ;;  %v3161_v55 = vpop.f32.mrb[12].mxu0 }
 0xad7   : > { %v5392_v59 = vpop.f32.mrb[17].mxu1  ;;  %v5399_v60 = vpop.f32.mrb[13].mxu0  ;;  %v3174_v42 = vsel %vm1776_vm4, %v3161_v55, -inf  ;;  %v3171_v44 = vsel %vm1776_vm4, %v3082_v53, -inf }
 0xad8   : > { %3175 = vmax.xlane.f32.xlu1 %v3174_v42  ;;  %3172 = vmax.xlane.f32.xlu0 %v3171_v44 }
 0xae9   : > { %2549 = vrot.lane.b32.xlu1 %v6391_v56, %s5786_s8 }
 0xaee   : > { %2551 = vrot.lane.b32.xlu0 %v6394_v58, %s5786_s8 }
 0xaf2   : > { %2553 = vrot.lane.b32.xlu0 %v6391_v56, %s5785_s20 }
 0xaf6   : > { %2555 = vrot.lane.b32.xlu0 %v6394_v58, %s5785_s20 }
 0xafa   : > { %2557 = vrot.lane.b32.xlu0 %v2542_v46, %s5785_s20 }
 0xafe   : > { %2559 = vrot.lane.b32.xlu0 %v2544_v54, %s5785_s20 }
 0xb02   : > { %2561 = vrot.lane.b32.xlu0 %v2546_v21, %s5785_s20 }
 0xb06   : > { %2563 = vrot.lane.b32.xlu0 %v2548_v61, %s5785_s20 }
 0xb5d   : > { %v3167_v20 = vpop.xlane.xlu1 %3166  ;;  %v3170_v1 = vpop.xlane.xlu0 %3169 }
 0xb5e   : > { %v3177_v62 = vsub.f32 %v2924_v38, %v3167_v20  ;;  %v3178_v24 = vsub.f32 %v3003_v41, %v3170_v1 }
 0xb60   : > { %v3181_v0 = vmul.f32 1.442695, %v3177_v62  ;;  %v3183_v27 = vmul.f32 1.442695, %v3178_v24 }
 0xb62   : > { %5592 = vpow2.f32 %v3181_v0 }
 0xb65   : > { %v3173_v56 = vpop.xlane.xlu0 %3172  ;;  %v3176_v11 = vpop.xlane.xlu1 %3175 }
 0xb66   : > { %v3179_v58 = vsub.f32 %v3082_v53, %v3173_v56  ;;  %v3180_v15 = vsub.f32 %v3161_v55, %v3176_v11 }
 0xb68   : > { %v3185_v6 = vmul.f32 1.442695, %v3179_v58  ;;  %v3187_v3 = vmul.f32 1.442695, %v3180_v15 }
 0xb69   : > { %v2550_v4 = vpop.permute.xlu1 %2549  ;;  %v2552_v14 = vpop.permute.xlu0 %2551 }
 0xb6a   : > { %5594 = vpow2.f32 %v3185_v6  ;;  %2565 = vrot.lane.b32.xlu0 %v2550_v4, %s5785_s20 }
 0xb6b   : > { %5596 = vpow2.f32 %v3187_v3 }
 0xb6c   : > { %v6455_v7 = vpop.eup %5592  ;;  %5598 = vpow2.f32 %v3183_v27 }
 0xb6d   : > { %v3189_v16 = vsel %vm1776_vm4, %v6455_v7, 0.0  ;;  %v2554_v31 = vpop.permute.xlu0 %2553 }
 0xb6e   : > { %2567 = vrot.lane.b32.xlu0 %v2552_v14, %s5785_s20  ;;  %3190 = vadd.xlane.f32.xlu1 %v3189_v16 }
 0xb71   : > { %v2556_v32 = vpop.permute.xlu0 %2555 }
 0xb74   : > { %v6460_v19 = vpop.eup %5594 }
 0xb75   : > { %v3195_v22 = vsel %vm1776_vm4, %v6460_v19, 0.0  ;;  %v6464_v23 = vpop.eup %5596  ;;  %v2558_v33 = vpop.permute.xlu0 %2557 }
 0xb76   : > { %3196 = vadd.xlane.f32.xlu1 %v3195_v22  ;;  %v3198_v25 = vsel %vm1776_vm4, %v6464_v23, 0.0  ;;  %v6468_v28 = vpop.eup %5598 }
 0xb77   : > { %v3192_v30 = vsel %vm1776_vm4, %v6468_v28, 0.0 }
 0xb79   : > { %v2560_v34 = vpop.permute.xlu0 %2559 }
 0xb7a   : > { %3199 = vadd.xlane.f32.xlu1 %v3198_v25 }
 0xb7d   : > { %v2562_v36 = vpop.permute.xlu0 %2561 }
 0xb7e   : > { %v2577_v39 = vcombine.low %v2554_v31, %v2562_v36  ;;  %v2578_v18 = vcombine.high %v2554_v31, %v2562_v36 }
 0xb80   : > { %v2585_v41 = vrot.slane %v2577_v39, %v6106_v40  ;;  %v2592_v43 = vrot.slane %v2578_v18, %v6106_v40 }
 0xb81   : > { %v2564_v37 = vpop.permute.xlu0 %2563 }
 0xb82   : > { %v2645_v52 = vcombine.low %v2556_v32, %v2564_v37  ;;  %v2646_v53 = vcombine.high %v2556_v32, %v2564_v37 }
 0xb84   : > { %v2653_v0 = vrot.slane %v2645_v52, %v6106_v40  ;;  %v2660_v1 = vrot.slane %v2646_v53, %v6106_v40 }
 0xb8d   : > { %3193 = vadd.xlane.f32.xlu0 %v3192_v30 }
 0xbdc   : > { %v2566_v45 = vpop.permute.xlu0 %2565 }
 0xbdd   : > { %v2593_v48 = vcombine.low %v2558_v33, %v2566_v45  ;;  %v2594_v38 = vcombine.high %v2558_v33, %v2566_v45 }
 0xbdf   : > { %v2601_v49 = vrot.slane %v2593_v48, %v6106_v40  ;;  %v2608_v51 = vrot.slane %v2594_v38, %v6106_v40 }
 0xbe0   : > { %v2568_v55 = vpop.permute.xlu0 %2567 }
 0xbe1   : > { %v2609_v59 = vcombine.low %v2585_v41, %v2601_v49  ;;  %v2610_v60 = vcombine.high %v2585_v41, %v2601_v49  ;;  %v2625_v42 = vcombine.low %v2592_v43, %v2608_v51  ;;  %v2626_v44 = vcombine.high %v2592_v43, %v2608_v51 }
 0xbe2   : > { %v2661_v46 = vcombine.low %v2560_v34, %v2568_v55  ;;  %v2662_v54 = vcombine.high %v2560_v34, %v2568_v55 }
 0xbe3   : > { %v2617_v21 = vrot.slane %v2609_v59, %v6109_v47  ;;  %v2624_v61 = vrot.slane %v2610_v60, %v6109_v47  ;;  %v2633_v20 = vrot.slane %v2625_v42, %v6109_v47  ;;  %v2640_v62 = vrot.slane %v2626_v44, %v6109_v47 }
 0xbe4   : > { %v2669_v56 = vrot.slane %v2661_v46, %v6106_v40  ;;  %v2676_v11 = vrot.slane %v2662_v54, %v6106_v40 }
 0xbe5   : > { %v2713_v58 = vcombine.low %v2617_v21, %v2624_v61  ;;  %v5118_v15 = vcombine.high %v2617_v21, %v2624_v61  ;;  %v2729_v6 = vcombine.low %v2633_v20, %v2640_v62  ;;  %v5119_v3 = vcombine.high %v2633_v20, %v2640_v62 }
 0xbe6   : > { %v2677_v4 = vcombine.low %v2653_v0, %v2669_v56  ;;  %v2678_v14 = vcombine.high %v2653_v0, %v2669_v56  ;;  %v2693_v16 = vcombine.low %v2660_v1, %v2676_v11  ;;  %v2694_v22 = vcombine.high %v2660_v1, %v2676_v11 }
 0xbe7   : > { %v2720_v24 = vrot.slane %v2713_v58, %v6106_v40  ;;  %v2728_v25 = vrot.slane %v5118_v15, %v6106_v40  ;;  %v2736_v27 = vrot.slane %v2729_v6, %v6106_v40  ;;  %v2744_v30 = vrot.slane %v5119_v3, %v6106_v40 }
 0xbe8   : > { %v2685_v31 = vrot.slane %v2677_v4, %v6109_v47  ;;  %v2692_v32 = vrot.slane %v2678_v14, %v6109_v47  ;;  %v2701_v33 = vrot.slane %v2693_v16, %v6109_v47  ;;  %v2708_v34 = vrot.slane %v2694_v22, %v6109_v47 }
 0xbe9   : > { %v2745_v36 = vcombine.low %v2720_v24, %v2728_v25  ;;  %v2761_v37 = vcombine.low %v2736_v27, %v2744_v30  ;;  %v2746_v39 = vcombine.high %v2720_v24, %v2728_v25  ;;  %v2762_v18 = vcombine.high %v2736_v27, %v2744_v30 }
 0xbea   : > { %v2781_v45 = vcombine.low %v2685_v31, %v2692_v32  ;;  %v5120_v48 = vcombine.high %v2685_v31, %v2692_v32  ;;  %v2797_v38 = vcombine.low %v2701_v33, %v2708_v34  ;;  %v5121_v41 = vcombine.high %v2701_v33, %v2708_v34 }
 0xbeb   : > { %v2753_v53 = vrot.slane %v2745_v36, %v6109_v47  ;;  %v2769_v55 = vrot.slane %v2761_v37, %v6109_v47  ;;  %v2760_v59 = vrot.slane %v2746_v39, %v6109_v47  ;;  %v2776_v60 = vrot.slane %v2762_v18, %v6109_v47 }
 0xbec   : > { %v2788_v43 = vrot.slane %v2781_v45, %v6106_v40  ;;  %v2796_v49 = vrot.slane %v5120_v48, %v6106_v40  ;;  %v2804_v51 = vrot.slane %v2797_v38, %v6106_v40  ;;  %v2812_v52 = vrot.slane %v5121_v41, %v6106_v40 }
 0xbed   : > { %v2777_v0 = vcombine.low %v2753_v53, %v2769_v55  ;;  %v2779_v56 = vcombine.low %v2760_v59, %v2776_v60  ;;  %v2778_v16 = vcombine.high %v2753_v53, %v2769_v55  ;;  %v2780_v33 = vcombine.high %v2760_v59, %v2776_v60 }
 0xbee   : > { %v2813_v42 = vcombine.low %v2788_v43, %v2796_v49  ;;  %v2829_v44 = vcombine.low %v2804_v51, %v2812_v52  ;;  %v2814_v46 = vcombine.high %v2788_v43, %v2796_v49  ;;  %v2830_v54 = vcombine.high %v2804_v51, %v2812_v52 }
 0xbf0   : > { %v2821_v21 = vrot.slane %v2813_v42, %v6109_v47  ;;  %v2837_v61 = vrot.slane %v2829_v44, %v6109_v47  ;;  %v2828_v20 = vrot.slane %v2814_v46, %v6109_v47  ;;  %v2844_v62 = vrot.slane %v2830_v54, %v6109_v47 }
 0xbf2   : > { %v2845_v1 = vcombine.low %v2821_v21, %v2837_v61  ;;  %v2847_v11 = vcombine.low %v2828_v20, %v2844_v62  ;;  %v2846_v4 = vcombine.high %v2821_v21, %v2837_v61  ;;  %v2848_v31 = vcombine.high %v2828_v20, %v2844_v62 }
 0xbf4   : > { %v5482_v58 = vpack.c.bf16 %v2845_v1, %v2777_v0  ;;  %v5488_v15 = vpack.c.bf16 %v2847_v11, %v2779_v56  ;;  %v5485_v24 = vpack.c.bf16 %v2846_v4, %v2778_v16  ;;  %v5491_v36 = vpack.c.bf16 %v2848_v31, %v2780_v33 }
 0xbf6   : > { %5483 = vmatpush3.bf16.msra.mxu1 %v5482_v58  ;;  %5489 = vmatpush3.bf16.msra.mxu0 %v5488_v15 }
 0xbf7   : > { %5484 = vmatprep.subr.bf16.mxu1 %v5781_v5  ;;  %5493 = vmatprep.subr.bf16.mxu0 %v5781_v5 }
 0xbfb   : > { %v3191_v6 = vpop.xlane.xlu1 %3190 }
 0xbfc   : > { %5600 = vrcp.f32 %v3191_v6 }
 0xc03   : > { %v3197_v3 = vpop.xlane.xlu1 %3196 }
 0xc04   : > { %5602 = vrcp.f32 %v3197_v3 }
 0xc06   : > { %v5601_v14 = vpop.eup %5600 }
 0xc07   : > { %v3202_v22 = vmul.f32 %v5601_v14, %v6455_v7  ;;  %v3200_v7 = vpop.xlane.xlu1 %3199 }
 0xc09   : > { %5405 = vmatmul.mubr.msk.f32.vlgmr.msra.gmra.mrb[18].mxu1 %vm1776_vm4, %v3202_v22 }
 0xc0a   : > { %5486 = vmatpush3.bf16.msra.mxu1 %v5485_v24  ;;  %5411 = vmatprep.mubr.msk.f32.mxu1 %vm5782_vm1, %v5783_v8 }
 0xc0b   : > { %5490 = vmatprep.subr.bf16.mxu1 %v5781_v5 }
 0xc0e   : > { %v5603_v25 = vpop.eup %5602 }
 0xc0f   : > { %v3206_v27 = vmul.f32 %v5603_v25, %v6460_v19 }
 0xc11   : > { %5419 = vmatmul.mubr.msk.f32.vlgmr.msra.gmra.mrb[14].mxu0 %vm1776_vm4, %v3206_v27 }
 0xc12   : > { %5495 = vmatpush3.bf16.msra.mxu0 %v6263_v63  ;;  %5436 = vmatprep.mubr.msk.f32.mxu0 %vm5782_vm1, %v5783_v8 }
 0xc13   : > { %5496 = vmatprep.subr.bf16.mxu0 %v5781_v5 }
 0xc16   : > { %5498 = vmatpush3.bf16.msra.mxu0 %v6269_v2 }
 0xc1a   : > { %v3194_v30 = vpop.xlane.xlu0 %3193 }
 0xc1b   : > { %5604 = vrcp.f32 %v3194_v30 }
 0xc1c   : > { %5606 = vrcp.f32 %v3200_v7 }
 0xc25   : > { %v5605_v32 = vpop.eup %5604 }
 0xc26   : > { %v3204_v19 = vmul.f32 %v5605_v32, %v6468_v28  ;;  %v5607_v34 = vpop.eup %5606 }
 0xc27   : > { %v3208_v5 = vmul.f32 %v5607_v34, %v6464_v23  ;;  %v5612_v34 = vld [vmem:[%s6032_s14] sm:$0xff] }
 0xc28   : > { %5412 = vmatmul.mubr.msk.f32.vlgmr.msra.gmra.mrb[20].mxu1 %vm1776_vm4, %v3204_v19  ;;  %v6548_v19 = vsub.s32 7, %v6049_v9 }
 0xc29   : > { %5492 = vmatpush3.bf16.msra.mxu1 %v5491_v36  ;;  %5425 = vmatprep.mubr.msk.f32.mxu1 %vm5782_vm1, %v5783_v8 }
 0xc2a   : > { %v3655_v36 = vrot.slane %v5612_v34, %v6548_v19  ;;  %v3758_v34 = vld [vmem:[%s6016_s13 + $0x28] sm:$0xff] }
 0xc2c   : > { %5426 = vmatmul.mubr.msk.f32.vlgmr.msra.gmra.mrb[22].mxu1 %vm1776_vm4, %v3208_v5 }
 0xcdc   : > { %v3278_v63 = vpop.f32.mrb[18].mxu1 }
 0xcdd   : > { %v5406_v2 = vpop.f32.mrb[19].mxu1 }
 0xce4   : > { %v3424_v37 = vpop.f32.mrb[14].mxu0 }
 0xce5   : > { %v3501_v39 = vcombine.low %v3278_v63, %v3424_v37  ;;  %v3502_v18 = vcombine.high %v3278_v63, %v3424_v37  ;;  %v5420_v45 = vpop.f32.mrb[15].mxu0 }
 0xce7   : > { %v3509_v51 = vrot.slane %v3501_v39, %v6106_v40  ;;  %v3516_v8 = vrot.slane %v3502_v18, %v6106_v40 }
 0xcfb   : > { %v3351_v48 = vpop.f32.mrb[20].mxu1 }
 0xcfc   : > { %v5413_v28 = vpop.f32.mrb[21].mxu1 }
 0xcff   : > { %v3497_v38 = vpop.f32.mrb[22].mxu1 }
 0xd00   : > { %v3517_v41 = vcombine.low %v3351_v48, %v3497_v38  ;;  %v3518_v43 = vcombine.high %v3351_v48, %v3497_v38  ;;  %v5427_v49 = vpop.f32.mrb[23].mxu1  ;;  %v3753_v38 = vld [vmem:[%s6016_s13] sm:$0xff] }
 0xd02   : > { %v3525_v23 = vrot.slane %v3517_v41, %v6106_v40  ;;  %v3532_v52 = vrot.slane %v3518_v43, %v6106_v40  ;;  %v3761_v41 = vld [vmem:[%s6016_s13 + $0x40] sm:$0xff]  ;;  %v3754_v43 = vld [vmem:[%s6016_s13 + $0x8] sm:$0xff] }
 0xd03   : > { %v5142_v49 = vcombine.high %v3753_v38, %v3761_v41 }
 0xd04   : > { %v3533_v53 = vcombine.low %v3509_v51, %v3525_v23  ;;  %v3534_v55 = vcombine.high %v3509_v51, %v3525_v23  ;;  %v3549_v59 = vcombine.low %v3516_v8, %v3532_v52  ;;  %v3550_v60 = vcombine.high %v3516_v8, %v3532_v52  ;;  %v3762_v51 = vld [vmem:[%s6016_s13 + $0x48] sm:$0xff]  ;;  %v3769_v52 = vld [vmem:[%s6016_s13 + $0x80] sm:$0xff] }
 0xd05   : > { %v5143_v8 = vcombine.low %v3754_v43, %v3762_v51  ;;  %v5144_v23 = vcombine.high %v3754_v43, %v3762_v51  ;;  %4033 = vmatprep.subr.bf16.mxu1 %v5142_v49  ;;  %v3767_v43 = vld [vmem:[%s6016_s13 + $0x70] sm:$0xff]  ;;  %v3760_v49 = vld [vmem:[%s6016_s13 + $0x38] sm:$0xff] }
 0xd06   : > { %v3541_v42 = vrot.slane %v3533_v53, %v6109_v47  ;;  %v3548_v44 = vrot.slane %v3534_v55, %v6109_v47  ;;  %v3557_v46 = vrot.slane %v3549_v59, %v6109_v47  ;;  %v3564_v54 = vrot.slane %v3550_v60, %v6109_v47  ;;  %v3777_v53 = vld [vmem:[%s6016_s13 + $0xc0] sm:$0xff]  ;;  %v3770_v55 = vld [vmem:[%s6016_s13 + $0x88] sm:$0xff]  ;;  %v3768_v51 = vld [vmem:[%s6016_s13 + $0x78] sm:$0xff] }
 0xd07   : > { %4074 = vmatprep.subr.bf16.mxu0 %v5144_v23  ;;  %v5158_v59 = vcombine.high %v3769_v52, %v3777_v53  ;;  %v3778_v60 = vld [vmem:[%s6016_s13 + $0xc8] sm:$0xff] }
 0xd08   : > { %v3569_v21 = vcombine.low %v3541_v42, %v3548_v44  ;;  %v5138_v61 = vcombine.high %v3541_v42, %v3548_v44  ;;  %v3585_v20 = vcombine.low %v3557_v46, %v3564_v54  ;;  %v5139_v62 = vcombine.high %v3557_v46, %v3564_v54  ;;  %v3755_v54 = vld [vmem:[%s6016_s13 + $0x10] sm:$0xff] }
 0xd09   : > { %v5157_v42 = vcombine.low %v3769_v52, %v3777_v53  ;;  %v5159_v44 = vcombine.low %v3770_v55, %v3778_v60  ;;  %v5160_v46 = vcombine.high %v3770_v55, %v3778_v60  ;;  %v5156_v52 = vcombine.high %v3760_v49, %v3768_v51  ;;  %v3775_v53 = vld [vmem:[%s6016_s13 + $0xb0] sm:$0xff]  ;;  %v3784_v60 = vld [vmem:[%s6016_s13 + $0xf8] sm:$0xff] }
 0xd0a   : > { %v3576_v0 = vrot.slane %v3569_v21, %v6106_v40  ;;  %v3584_v1 = vrot.slane %v5138_v61, %v6106_v40  ;;  %v3592_v56 = vrot.slane %v3585_v20, %v6106_v40  ;;  %v3600_v11 = vrot.slane %v5139_v62, %v6106_v40  ;;  %v3763_v21 = vld [vmem:[%s6016_s13 + $0x50] sm:$0xff]  ;;  %v3756_v61 = vld [vmem:[%s6016_s13 + $0x18] sm:$0xff] }
 0xd0b   : > { %v5795_v20 = vmov 0   ;;  %v5146_v62 = vcombine.high %v3755_v54, %v3763_v21  ;;  %v3783_v55 = vld [vmem:[%s6016_s13 + $0xf0] sm:$0xff] }
 0xd0c   : > { %v3601_v58 = vcombine.low %v3576_v0, %v3584_v1  ;;  %v3617_v15 = vcombine.low %v3592_v56, %v3600_v11  ;;  %v3602_v6 = vcombine.high %v3576_v0, %v3584_v1  ;;  %v3618_v3 = vcombine.high %v3592_v56, %v3600_v11  ;;  %4065 = vmatprep.mubr.bf16.mxu1 %v5795_v20  ;;  %v3764_v0 = vld [vmem:[%s6016_s13 + $0x58] sm:$0xff] }
 0xd0d   : > { %v5145_v1 = vcombine.low %v3755_v54, %v3763_v21  ;;  %v5147_v56 = vcombine.low %v3756_v61, %v3764_v0  ;;  %v5148_v11 = vcombine.high %v3756_v61, %v3764_v0  ;;  %v4377_v21 = vld [vmem:[%s6034_s18] sm:$0xff]  ;;  %v4386_v0 = vld [vmem:[%s6034_s18 + $0x48] sm:$0xff] }
 0xd0e   : > { %v3609_v4 = vrot.slane %v3601_v58, %v6109_v47  ;;  %v3625_v14 = vrot.slane %v3617_v15, %v6109_v47  ;;  %v3616_v16 = vrot.slane %v3602_v6, %v6109_v47  ;;  %v3632_v22 = vrot.slane %v3618_v3, %v6109_v47  ;;  %v4385_v61 = vld [vmem:[%s6034_s18 + $0x40] sm:$0xff] }
 0xd0f   : > { %v3746_v3 = vrot.slane %v6309_v29, %v6254_v57 }
 0xd10   : > { %v3634_v24 = vcombine.high %v3609_v4, %v3625_v14  ;;  %v3635_v25 = vcombine.low %v3616_v16, %v3632_v22  ;;  %v3636_v27 = vcombine.high %v3616_v16, %v3632_v22  ;;  %v3633_v7 = vcombine.low %v3609_v4, %v3625_v14 }
 0xd11   : > { %v3751_v14 = vrot.slane %v6309_v29, %v6295_v17  ;;  %v3766_v29 = vld [vmem:[%s6016_s13 + $0x68] sm:$0xff] }
 0xd12   : > { %3638 = vrot.lane.b32.xlu1 %v3634_v24, %s5793_s24  ;;  %v3771_v24 = vld [vmem:[%s6016_s13 + $0x90] sm:$0xff] }
 0xd16   : > { %3642 = vrot.lane.b32.xlu1 %v3635_v25, %s5792_s3  ;;  %v3779_v25 = vld [vmem:[%s6016_s13 + $0xd0] sm:$0xff] }
 0xd1a   : > { %3646 = vrot.lane.b32.xlu1 %v3636_v27, %s5794_s27  ;;  %v3772_v27 = vld [vmem:[%s6016_s13 + $0x98] sm:$0xff] }
 0xd84   : > { %v3639_v40 = vpop.permute.xlu1 %3638 }
 0xd85   : > { %v3649_v31 = vsel %vm986_vm3, %v3633_v7, %v3639_v40  ;;  %v3780_v7 = vld [vmem:[%s6016_s13 + $0xd8] sm:$0xff] }
 0xd88   : > { %v3643_v30 = vpop.permute.xlu1 %3642 }
 0xd89   : > { %v3650_v32 = vsel %vm1776_vm4, %v3649_v31, %v3643_v30  ;;  %v5162_v31 = vcombine.high %v3771_v24, %v3779_v25 }
 0xd8c   : > { %v3647_v33 = vpop.permute.xlu1 %3646 }
 0xd8d   : > { %v3651_v47 = vsel %vm1778_vm5, %v3650_v32, %v3647_v33  ;;  %v5164_v32 = vcombine.high %v3772_v27, %v3780_v7  ;;  %v3757_v33 = vld [vmem:[%s6016_s13 + $0x20] sm:$0xff] }
 0xd8e   : > { %5437 = vmatmul.mubr.msk.f32.vlgmr.msra.gmra.mrb[16].mxu0 %vm416_vm2, %v3651_v47  ;;  %v3765_v47 = vld [vmem:[%s6016_s13 + $0x60] sm:$0xff] }
 0xd8f   : > { %4075 = vmatpush1.bf16.msra.mxu0 %v5143_v8  ;;  %4106 = vmatprep.mubr.bf16.mxu0 %v5795_v20 }
 0xd90   : > { %4076 = vmatprep.subr.bf16.mxu0 %v5160_v46  ;;  %v5170_v46 = vcombine.high %v3775_v53, %v3783_v55 }
 0xd93   : > { %4077 = vmatpush1.bf16.msra.mxu0 %v5159_v44  ;;  %v5155_v44 = vcombine.low %v3760_v49, %v3768_v51 }
 0xd94   : > { %4156 = vmatprep.subr.bf16.mxu0 %v5148_v11  ;;  %v5182_v11 = vcombine.high %v4377_v21, %v4385_v61 }
 0xe61   : > { %v3725_v5 = vpop.f32.mrb[16].mxu0 }
 0xe62   : > { %v3726_v63 = vadd.f32 %v3725_v5, %v3655_v36  ;;  %v5438_v2 = vpop.f32.mrb[17].mxu0  ;;  %v5161_v36 = vcombine.low %v3771_v24, %v3779_v25  ;;  %v5163_v5 = vcombine.low %v3772_v27, %v3780_v7  ;;  %v4379_v27 = vld [vmem:[%s6034_s18 + $0x10] sm:$0xff] }
 0xe63   : > { %v5152_v2 = vcombine.high %v3758_v34, %v3766_v29  ;;  %v4387_v7 = vld [vmem:[%s6034_s18 + $0x50] sm:$0xff] }
 0xe64   : > { %v3729_v37 = vadd.f32 %v3726_v63, %v6319_v35  ;;  %v5141_v35 = vcombine.low %v3753_v38, %v3761_v41  ;;  %v5150_v63 = vcombine.high %v3757_v33, %v3765_v47  ;;  %v3759_v41 = vld [vmem:[%s6016_s13 + $0x30] sm:$0xff] }
 0xe65   : > { %v5154_v23 = vcombine.high %v3759_v41, %v3767_v43 }
 0xe66   : > { %v3730_v39 = vsel %vm416_vm2, %v3729_v37, 0.0  ;;  %4034 = vmatpush1.bf16.msra.mxu1 %v5141_v35 }
 0xe67   : > { %3731 = vadd.xlane.f32.xlu0 %v3730_v39  ;;  %4035 = vmatprep.subr.bf16.mxu1 %v5158_v59  ;;  %v3781_v39 = vld [vmem:[%s6016_s13 + $0xe0] sm:$0xff]  ;;  %v3776_v59 = vld [vmem:[%s6016_s13 + $0xb8] sm:$0xff] }
 0xe68   : > { %v5172_v54 = vcombine.high %v3776_v59, %v3784_v60 }
 0xe6a   : > { %4036 = vmatpush1.bf16.msra.mxu1 %v5157_v42  ;;  %v5153_v42 = vcombine.low %v3759_v41, %v3767_v43 }
 0xe6b   : > { %4115 = vmatprep.subr.bf16.mxu1 %v5146_v62  ;;  %v4378_v62 = vld [vmem:[%s6034_s18 + $0x8] sm:$0xff] }
 0xef4   : > { %v3732_v18 = vpop.xlane.xlu0 %3731 }
 0xef5   : > { %v3733_v45 = vmul.f32 0.03125, %v3732_v18  ;;  %v3774_v18 = vld [vmem:[%s6016_s13 + $0xa8] sm:$0xff] }
 0xef7   : > { %v3734_v48 = vsub.f32 %v3729_v37, %v3733_v45  ;;  %v3773_v37 = vld [vmem:[%s6016_s13 + $0xa0] sm:$0xff]  ;;  %v3782_v45 = vld [vmem:[%s6016_s13 + $0xe8] sm:$0xff] }
 0xef8   : > { %v5168_v38 = vcombine.high %v3774_v18, %v3782_v45  ;;  %v5165_v35 = vcombine.low %v3773_v37, %v3781_v39  ;;  %v5167_v8 = vcombine.low %v3774_v18, %v3782_v45 }
 0xef9   : > { %v3735_v9 = vmul.f32 %v3734_v48, %v3734_v48 }
 0xefb   : > { %v3736_v28 = vsel %vm416_vm2, %v3735_v9, 0.0  ;;  %v5151_v9 = vcombine.low %v3758_v34, %v3766_v29  ;;  %v6634_v29 = vld [vmem:[%s6027_s11] sm:$0xff] }
 0xefc   : > { %3737 = vadd.xlane.f32.xlu1 %v3736_v28  ;;  %v5166_v28 = vcombine.high %v3773_v37, %v3781_v39 }
 0xf89   : > { %v3738_v58 = vpop.xlane.xlu1 %3737 }
 0xf8a   : > { %v3739_v15 = vmul.f32 0.03125, %v3738_v58  ;;  %v5184_v58 = vcombine.high %v4378_v62, %v4386_v0 }
 0xf8c   : > { %v3740_v6 = vadd.f32 1e-05, %v3739_v15  ;;  %v5181_v15 = vcombine.low %v4377_v21, %v4385_v61 }
 0xf8e   : > { %5608 = vrsqrt.f32 %v3740_v6  ;;  %v5183_v6 = vcombine.low %v4378_v62, %v4386_v0 }
 0xf98   : > { %v5609_v4 = vpop.eup %5608 }
 0xf99   : > { %v3742_v16 = vmul.f32 %v5609_v4, %v3734_v48  ;;  %v5149_v48 = vcombine.low %v3757_v33, %v3765_v47  ;;  %v4394_v4 = vld [vmem:[%s6034_s18 + $0x88] sm:$0xff]  ;;  %v5185_v33 = vcombine.low %v4379_v27, %v4387_v7 }
 0xf9b   : > { %v3747_v22 = vmul.f32 %v3746_v3, %v3742_v16  ;;  %v4393_v3 = vld [vmem:[%s6034_s18 + $0x80] sm:$0xff]  ;;  %v4402_v16 = vld [vmem:[%s6034_s18 + $0xc8] sm:$0xff] }
 0xf9c   : > { %v5199_v24 = vcombine.low %v4394_v4, %v4402_v16  ;;  %v5200_v25 = vcombine.high %v4394_v4, %v4402_v16  ;;  %v3809_v4 = vrot.slane %v6634_v29, %v6295_v17 }
 0xf9d   : > { %v6577_v40 = vadd.f32 %v3751_v14, %v3747_v22 }
 0xf9f   : > { %v6581_v30 = vpack.c.bf16 %v6577_v40, %v6577_v40 }
 0xfa1   : > { %5173 = vmatmul.mubr.msk.bf16.vlgmr.msra.gmra.mrb[24].mxu1 %vm416_vm2, %v6581_v30  ;;  %5174 = vmatmul.mubr.msk.bf16.vlgmr.msra.gmra.mrb[20].mxu0 %vm416_vm2, %v6581_v30 }
 0xfa2   : > { %4116 = vmatpush1.bf16.msra.mxu1 %v5145_v1  ;;  %4157 = vmatpush1.bf16.msra.mxu0 %v5147_v56  ;;  %v5169_v1 = vcombine.low %v3775_v53, %v3783_v55  ;;  %v5171_v56 = vcombine.low %v3776_v59, %v3784_v60  ;;  %v4403_v55 = vld [vmem:[%s6034_s18 + $0xd0] sm:$0xff]  ;;  %v4396_v59 = vld [vmem:[%s6034_s18 + $0x98] sm:$0xff] }
 0xfa3   : > { %4117 = vmatprep.subr.bf16.mxu1 %v5162_v31  ;;  %4158 = vmatprep.subr.bf16.mxu0 %v5164_v32  ;;  %v5186_v31 = vcombine.high %v4379_v27, %v4387_v7  ;;  %v4388_v32 = vld [vmem:[%s6034_s18 + $0x58] sm:$0xff] }
 0xfa4   : > { %4147 = vmatprep.mubr.bf16.mxu1 %v5795_v20  ;;  %4188 = vmatprep.mubr.bf16.mxu0 %v5795_v20  ;;  %v4404_v60 = vld [vmem:[%s6034_s18 + $0xd8] sm:$0xff] }
 0xfa5   : > { %v5204_v0 = vcombine.high %v4396_v59, %v4404_v60 }
 0xfa6   : > { %4118 = vmatpush1.bf16.msra.mxu1 %v5161_v36  ;;  %4159 = vmatpush1.bf16.msra.mxu0 %v5163_v5  ;;  %v3793_v36 = vrot.slane %v6634_v29, %v6065_v13  ;;  %v3801_v5 = vrot.slane %v6634_v29, %v6097_v26 }
 0xfa7   : > { %4197 = vmatprep.subr.bf16.mxu1 %v5150_v63  ;;  %4238 = vmatprep.subr.bf16.mxu0 %v5152_v2  ;;  %v3797_v63 = vrot.slane %v6634_v29, %v6062_v12  ;;  %v3805_v2 = vrot.slane %v6634_v29, %v6254_v57 }
 0xfa9   : > { %5175 = vmatmul.mubr.msk.bf16.vlgmr.msra.gmra.mrb[28].mxu1 %vm416_vm2, %v6581_v30  ;;  %5176 = vmatmul.mubr.msk.bf16.vlgmr.msra.gmra.mrb[24].mxu0 %vm416_vm2, %v6581_v30 }
 0xfaa   : > { %4198 = vmatpush1.bf16.msra.mxu1 %v5149_v48  ;;  %4239 = vmatpush1.bf16.msra.mxu0 %v5151_v9 }
 0xfab   : > { %4199 = vmatprep.subr.bf16.mxu1 %v5166_v28  ;;  %4240 = vmatprep.subr.bf16.mxu0 %v5168_v38 }
 0xfac   : > { %4229 = vmatprep.mubr.bf16.mxu1 %v5795_v20  ;;  %4270 = vmatprep.mubr.bf16.mxu0 %v5795_v20 }
 0xfae   : > { %4200 = vmatpush1.bf16.msra.mxu1 %v5165_v35  ;;  %4241 = vmatpush1.bf16.msra.mxu0 %v5167_v8 }
 0xfaf   : > { %4279 = vmatprep.subr.bf16.mxu1 %v5154_v23  ;;  %4320 = vmatprep.subr.bf16.mxu0 %v5156_v52  ;;  %v4395_v23 = vld [vmem:[%s6034_s18 + $0x90] sm:$0xff] }
 0xfb0   : > { %v5202_v62 = vcombine.high %v4395_v23, %v4403_v55 }
 0xfb1   : > { %5177 = vmatmul.mubr.msk.bf16.vlgmr.msra.gmra.mrb[32].mxu1 %vm416_vm2, %v6581_v30  ;;  %5178 = vmatmul.mubr.msk.bf16.vlgmr.msra.gmra.mrb[28].mxu0 %vm416_vm2, %v6581_v30 }
 0xfb2   : > { %4280 = vmatpush1.bf16.msra.mxu1 %v5153_v42  ;;  %4321 = vmatpush1.bf16.msra.mxu0 %v5155_v44 }
 0xfb3   : > { %4281 = vmatprep.subr.bf16.mxu1 %v5170_v46  ;;  %4322 = vmatprep.subr.bf16.mxu0 %v5172_v54  ;;  %v3813_v46 = vrot.slane %v6634_v29, %v6289_v10  ;;  %v3821_v54 = vrot.slane %v6634_v29, %v6548_v19 }
 0xfb4   : > { %4311 = vmatprep.mubr.bf16.mxu1 %v5795_v20  ;;  %4352 = vmatprep.mubr.bf16.mxu0 %v5795_v20  ;;  %v4401_v20 = vld [vmem:[%s6034_s18 + $0xc0] sm:$0xff] }
 0xfb5   : > { %v5198_v14 = vcombine.high %v4393_v3, %v4401_v20  ;;  %v5197_v22 = vcombine.low %v4393_v3, %v4401_v20 }
 0xfb6   : > { %4282 = vmatpush1.bf16.msra.mxu1 %v5169_v1  ;;  %4323 = vmatpush1.bf16.msra.mxu0 %v5171_v56 }
 0xfb7   : > { %4589 = vmatprep.subr.bf16.mxu1 %v5182_v11  ;;  %4629 = vmatprep.subr.bf16.mxu0 %v5184_v58 }
 0xfb9   : > { %5179 = vmatmul.mubr.msk.bf16.vlgmr.msra.gmra.mrb[36].mxu1 %vm416_vm2, %v6581_v30  ;;  %5180 = vmatmul.mubr.msk.bf16.vlgmr.msra.gmra.mrb[32].mxu0 %vm416_vm2, %v6581_v30  ;;  %v4380_v30 = vld [vmem:[%s6034_s18 + $0x18] sm:$0xff] }
 0xfba   : > { %v5187_v47 = vcombine.low %v4380_v30, %v4388_v32  ;;  %v5188_v34 = vcombine.high %v4380_v30, %v4388_v32  ;;  %v4389_v30 = vld [vmem:[%s6034_s18 + $0x60] sm:$0xff]  ;;  %v4390_v32 = vld [vmem:[%s6034_s18 + $0x68] sm:$0xff] }
 0xfbf   : > { %4590 = vmatpush1.bf16.xpose.msra.mxu1 %v5181_v15  ;;  %4630 = vmatpush1.bf16.xpose.msra.mxu0 %v5183_v6 }
 0xfc0   : > { %4591 = vmatprep.subr.bf16.mxu1 %v5198_v14  ;;  %4631 = vmatprep.subr.bf16.mxu0 %v5200_v25  ;;  %v3817_v14 = vrot.slane %v6634_v29, %v6338_v50  ;;  %v4381_v25 = vld [vmem:[%s6034_s18 + $0x20] sm:$0xff] }
 0xfc7   : > { %4592 = vmatpush1.bf16.xpose.msra.mxu1 %v5197_v22  ;;  %4632 = vmatpush1.bf16.xpose.msra.mxu0 %v5199_v24  ;;  %v6657_v24 = vld [vmem:[%s6027_s11 + $0x8] sm:$0xff] }
 0xfc8   : > { %4669 = vmatprep.subr.bf16.mxu1 %v5186_v31  ;;  %4709 = vmatprep.subr.bf16.mxu0 %v5188_v34  ;;  %v4382_v31 = vld [vmem:[%s6034_s18 + $0x28] sm:$0xff]  ;;  %v3837_v29 = vrot.slane %v6657_v24, %v6254_v57 }
0x1074   : > { %v4067_v37 = vpop.f32.mrb[24].mxu1  ;;  %v4108_v39 = vpop.f32.mrb[20].mxu0 }
0x1075   : > { %v4068_v18 = vadd.f32 %v4067_v37, %v3793_v36  ;;  %v4109_v45 = vadd.f32 %v4108_v39, %v3801_v5  ;;  %v4069_v48 = vpop.f32.mrb[25].mxu1  ;;  %v4110_v9 = vpop.f32.mrb[21].mxu0  ;;  %v3829_v5 = vrot.slane %v6657_v24, %v6062_v12  ;;  %v5190_v37 = vcombine.high %v4381_v25, %v4389_v30 }
0x1076   : > { %v4070_v28 = vadd.f32 %v4069_v48, %v3797_v63  ;;  %v4111_v38 = vadd.f32 %v4110_v9, %v3805_v2  ;;  %v4071_v41 = vpop.f32.mrb[26].mxu1  ;;  %v4112_v43 = vpop.f32.mrb[22].mxu0  ;;  %v5192_v39 = vcombine.high %v4382_v31, %v4390_v32 }
0x1077   : > { %v4361_v49 = vmax.f32 %v4068_v18, 0.0  ;;  %v4363_v51 = vmax.f32 %v4109_v45, 0.0  ;;  %v4072_v35 = vpop.f32.mrb[27].mxu1  ;;  %v4113_v8 = vpop.f32.mrb[23].mxu0 }
0x1078   : > { %v4362_v52 = vmax.f32 %v4070_v28, 0.0  ;;  %v4364_v53 = vmax.f32 %v4111_v38, 0.0 }
0x1079   : > { %v4409_v21 = vpack.c.bf16 %v4361_v49, %v4361_v49  ;;  %v4411_v61 = vpack.c.bf16 %v4363_v51, %v4363_v51 }
0x107a   : > { %v4410_v42 = vpack.c.bf16 %v4362_v52, %v4362_v52  ;;  %v4412_v44 = vpack.c.bf16 %v4364_v53, %v4364_v53  ;;  %v4405_v52 = vld [vmem:[%s6034_s18 + $0xe0] sm:$0xff]  ;;  %v4398_v53 = vld [vmem:[%s6034_s18 + $0xa8] sm:$0xff] }
0x107c   : > { %v4149_v1 = vpop.f32.mrb[28].mxu1  ;;  %v4190_v56 = vpop.f32.mrb[24].mxu0  ;;  %4621 = vmatprep.mubr.bf16.mxu1 %v4410_v42  ;;  %4661 = vmatprep.mubr.bf16.mxu0 %v4412_v44 }
0x107d   : > { %v4151_v11 = vpop.f32.mrb[29].mxu1  ;;  %v4192_v58 = vpop.f32.mrb[25].mxu0  ;;  %4622 = vmatmul.mubr.bf16.vlgmr.msra.gmra.mrb[40].mxu1 %v4409_v21  ;;  %4662 = vmatmul.mubr.bf16.vlgmr.msra.gmra.mrb[36].mxu0 %v4411_v61  ;;  %v4150_v63 = vadd.f32 %v4149_v1, %v3809_v4  ;;  %v4191_v2 = vadd.f32 %v4190_v56, %v3817_v14  ;;  %v4383_v4 = vld [vmem:[%s6034_s18 + $0x30] sm:$0xff] }
0x107e   : > { %v4152_v15 = vadd.f32 %v4151_v11, %v3813_v46  ;;  %v4193_v6 = vadd.f32 %v4192_v58, %v3821_v54  ;;  %4670 = vmatpush1.bf16.xpose.msra.mxu1 %v5185_v33  ;;  %4710 = vmatpush1.bf16.xpose.msra.mxu0 %v5187_v47  ;;  %v4153_v3 = vpop.f32.mrb[30].mxu1  ;;  %v4194_v20 = vpop.f32.mrb[26].mxu0  ;;  %v5201_v33 = vcombine.low %v4395_v23, %v4403_v55  ;;  %v4397_v23 = vld [vmem:[%s6034_s18 + $0xa0] sm:$0xff]  ;;  %v4406_v55 = vld [vmem:[%s6034_s18 + $0xe8] sm:$0xff]  ;;  %v4391_v14 = vld [vmem:[%s6034_s18 + $0x70] sm:$0xff] }
0x107f   : > { %v4154_v16 = vpop.f32.mrb[31].mxu1  ;;  %v4195_v22 = vpop.f32.mrb[27].mxu0  ;;  %4671 = vmatprep.subr.bf16.mxu1 %v5202_v62  ;;  %4711 = vmatprep.subr.bf16.mxu0 %v5204_v0  ;;  %v5203_v47 = vcombine.low %v4396_v59, %v4404_v60  ;;  %v4365_v41 = vmax.f32 %v4150_v63, 0.0  ;;  %v4367_v43 = vmax.f32 %v4191_v2, 0.0  ;;  %v5189_v60 = vcombine.low %v4381_v25, %v4389_v30  ;;  %v4392_v25 = vld [vmem:[%s6034_s18 + $0x78] sm:$0xff]  ;;  %v4407_v63 = vld [vmem:[%s6034_s18 + $0xf0] sm:$0xff] }
0x1080   : > { %v4366_v27 = vmax.f32 %v4152_v15, 0.0  ;;  %v4368_v7 = vmax.f32 %v4193_v6, 0.0  ;;  %v5191_v54 = vcombine.low %v4382_v31, %v4390_v32  ;;  %v5206_v62 = vcombine.high %v4397_v23, %v4405_v52  ;;  %v4384_v22 = vld [vmem:[%s6034_s18 + $0x38] sm:$0xff] }
0x1081   : > { %v4413_v42 = vpack.c.bf16 %v4365_v41, %v4365_v41  ;;  %v4415_v44 = vpack.c.bf16 %v4367_v43, %v4367_v43  ;;  %v5208_v0 = vcombine.high %v4398_v53, %v4406_v55  ;;  %v3825_v15 = vrot.slane %v6657_v24, %v6065_v13 }
0x1082   : > { %v4414_v34 = vpack.c.bf16 %v4366_v27, %v4366_v27  ;;  %v4416_v36 = vpack.c.bf16 %v4368_v7, %v4368_v7  ;;  %v3833_v20 = vrot.slane %v6657_v24, %v6097_v26  ;;  %v3845_v16 = vrot.slane %v6657_v24, %v6289_v10 }
0x1083   : > { %v3853_v27 = vrot.slane %v6657_v24, %v6548_v19  ;;  %v5205_v7 = vcombine.low %v4397_v23, %v4405_v52  ;;  %v5207_v31 = vcombine.low %v4398_v53, %v4406_v55  ;;  %v5194_v32 = vcombine.high %v4383_v4, %v4391_v14  ;;  %v4399_v19 = vld [vmem:[%s6034_s18 + $0xb0] sm:$0xff]  ;;  %v5613_v55 = vld [vmem:[%s6032_s14 + $0x8] sm:$0x7f] }
0x1084   : > { %v4231_v18 = vpop.f32.mrb[32].mxu1  ;;  %v4272_v45 = vpop.f32.mrb[28].mxu0  ;;  %4701 = vmatprep.mubr.bf16.mxu1 %v4414_v34  ;;  %4741 = vmatprep.mubr.bf16.mxu0 %v4416_v36  ;;  %v3841_v41 = vrot.slane %v6657_v24, %v6295_v17  ;;  %v3849_v43 = vrot.slane %v6657_v24, %v6338_v50  ;;  %v4428_v24 = vrot.slane %v5613_v55, %v6065_v13 }
0x1085   : > { %v4233_v48 = vpop.f32.mrb[33].mxu1  ;;  %v4274_v9 = vpop.f32.mrb[29].mxu0  ;;  %v4232_v30 = vadd.f32 %v4231_v18, %v3825_v15  ;;  %v4273_v26 = vadd.f32 %v4272_v45, %v3833_v20  ;;  %v4408_v18 = vld [vmem:[%s6034_s18 + $0xf8] sm:$0xff] }
0x1086   : > { %v4234_v28 = vadd.f32 %v4233_v48, %v3829_v5  ;;  %v4275_v38 = vadd.f32 %v4274_v9, %v3837_v29  ;;  %4672 = vmatpush1.bf16.xpose.msra.mxu1 %v5201_v33  ;;  %4712 = vmatpush1.bf16.xpose.msra.mxu0 %v5203_v47  ;;  %v4235_v12 = vpop.f32.mrb[34].mxu1  ;;  %v4276_v57 = vpop.f32.mrb[30].mxu0  ;;  %v5196_v33 = vcombine.high %v4384_v22, %v4392_v25 }
0x1087   : > { %v4236_v49 = vpop.f32.mrb[35].mxu1  ;;  %v4277_v51 = vpop.f32.mrb[31].mxu0  ;;  %4749 = vmatprep.subr.bf16.mxu1 %v5190_v37  ;;  %4789 = vmatprep.subr.bf16.mxu0 %v5192_v39  ;;  %v4369_v36 = vmax.f32 %v4232_v30, 0.0  ;;  %v4371_v5 = vmax.f32 %v4273_v26, 0.0  ;;  %v5193_v37 = vcombine.low %v4383_v4, %v4391_v14  ;;  %v4400_v39 = vld [vmem:[%s6034_s18 + $0xb8] sm:$0xff]  ;;  %v5195_v9 = vcombine.low %v4384_v22, %v4392_v25 }
0x1088   : > { %v4370_v35 = vmax.f32 %v4234_v28, 0.0  ;;  %v4372_v8 = vmax.f32 %v4275_v38, 0.0  ;;  %v5210_v28 = vcombine.high %v4399_v19, %v4407_v63  ;;  %v5212_v12 = vcombine.high %v4400_v39, %v4408_v18 }
0x1089   : > { %v4417_v48 = vpack.c.bf16 %v4369_v36, %v4369_v36  ;;  %v4419_v45 = vpack.c.bf16 %v4371_v5, %v4371_v5  ;;  %v5209_v49 = vcombine.low %v4399_v19, %v4407_v63 }
0x108a   : > { %v4418_v59 = vpack.c.bf16 %v4370_v35, %v4370_v35  ;;  %v4420_v46 = vpack.c.bf16 %v4372_v8, %v4372_v8  ;;  %v5211_v35 = vcombine.low %v4400_v39, %v4408_v18 }
0x108c   : > { %v6671_v21 = vpop.f32.mrb[36].mxu1  ;;  %v6673_v61 = vpop.f32.mrb[32].mxu0 }
0x108d   : > { %4702 = vmatmul.mubr.bf16.vlgmr.msra.gmra.mrb[44].mxu1 %v4413_v42  ;;  %4742 = vmatmul.mubr.bf16.vlgmr.msra.gmra.mrb[40].mxu0 %v4415_v44  ;;  %v4315_v1 = vpop.f32.mrb[37].mxu1  ;;  %v4356_v56 = vpop.f32.mrb[33].mxu0  ;;  %v4314_v51 = vadd.f32 %v6671_v21, %v3841_v41  ;;  %v4355_v8 = vadd.f32 %v6673_v61, %v3849_v43  ;;  %v4926_v43 = vrot.slane %v5613_v55, %v6289_v10 }
0x108e   : > { %4750 = vmatpush1.bf16.xpose.msra.mxu1 %v5189_v60  ;;  %4781 = vmatprep.mubr.bf16.mxu1 %v4418_v59  ;;  %v4317_v11 = vpop.f32.mrb[38].mxu1  ;;  %v4358_v58 = vpop.f32.mrb[34].mxu0  ;;  %v4316_v47 = vadd.f32 %v4315_v1, %v3845_v16  ;;  %v4357_v34 = vadd.f32 %v4356_v56, %v3853_v27 }
0x108f   : > { %4790 = vmatpush1.bf16.xpose.msra.mxu0 %v5191_v54  ;;  %4821 = vmatprep.mubr.bf16.mxu0 %v4420_v46  ;;  %v4318_v6 = vpop.f32.mrb[39].mxu1  ;;  %v4359_v3 = vpop.f32.mrb[35].mxu0  ;;  %v4373_v23 = vmax.f32 %v4314_v51, 0.0  ;;  %v4375_v52 = vmax.f32 %v4355_v8, 0.0  ;;  %v4931_v51 = vrot.slane %v5613_v55, %v6338_v50 }
0x1090   : > { %4751 = vmatprep.subr.bf16.mxu1 %v5206_v62  ;;  %4791 = vmatprep.subr.bf16.mxu0 %v5208_v0  ;;  %v4374_v29 = vmax.f32 %v4316_v47, 0.0  ;;  %v4376_v2 = vmax.f32 %v4357_v34, 0.0 }
0x1091   : > { %v4421_v17 = vpack.c.bf16 %v4373_v23, %v4373_v23  ;;  %v4423_v53 = vpack.c.bf16 %v4375_v52, %v4375_v52 }
0x1092   : > { %v4422_v38 = vpack.c.bf16 %v4374_v29, %v4374_v29  ;;  %v4424_v57 = vpack.c.bf16 %v4376_v2, %v4376_v2 }
0x1096   : > { %4752 = vmatpush1.bf16.xpose.msra.mxu1 %v5205_v7 }
0x1097   : > { %4792 = vmatpush1.bf16.xpose.msra.mxu0 %v5207_v31  ;;  %4829 = vmatprep.subr.bf16.mxu1 %v5194_v32 }
0x1098   : > { %4869 = vmatprep.subr.bf16.mxu0 %v5196_v33 }
0x109d   : > { %4782 = vmatmul.mubr.bf16.vlgmr.msra.gmra.mrb[48].mxu1 %v4417_v48 }
0x109e   : > { %4822 = vmatmul.mubr.bf16.vlgmr.msra.gmra.mrb[44].mxu0 %v4419_v45  ;;  %4830 = vmatpush1.bf16.xpose.msra.mxu1 %v5193_v37 }
0x109f   : > { %4861 = vmatprep.mubr.bf16.mxu1 %v4422_v38  ;;  %4870 = vmatpush1.bf16.xpose.msra.mxu0 %v5195_v9 }
0x10a0   : > { %4901 = vmatprep.mubr.bf16.mxu0 %v4424_v57  ;;  %4831 = vmatprep.subr.bf16.mxu1 %v5210_v28 }
0x10a1   : > { %4871 = vmatprep.subr.bf16.mxu0 %v5212_v12 }
0x10a6   : > { %4832 = vmatpush1.bf16.xpose.msra.mxu1 %v5209_v49 }
0x10a7   : > { %4872 = vmatpush1.bf16.xpose.msra.mxu0 %v5211_v35 }
0x10ad   : > { %4862 = vmatmul.mubr.bf16.vlgmr.msra.gmra.mrb[52].mxu1 %v4421_v17 }
0x10ae   : > { %4902 = vmatmul.mubr.bf16.vlgmr.msra.gmra.mrb[48].mxu0 %v4423_v53 }
0x1150   : > { %v4623_v59 = vpop.f32.mrb[40].mxu1  ;;  %v4663_v60 = vpop.f32.mrb[36].mxu0 }
0x1151   : > { %v4624_v42 = vadd.f32 %v4623_v59, %v4428_v24  ;;  %v4625_v44 = vpop.f32.mrb[41].mxu1  ;;  %v4665_v46 = vpop.f32.mrb[37].mxu0 }
0x1152   : > { %v4626_v54 = vpop.f32.mrb[42].mxu1  ;;  %v4666_v21 = vpop.f32.mrb[38].mxu0 }
0x1153   : > { %v4664_v62 = vadd.f32 %v4663_v60, %v4624_v42  ;;  %v4627_v61 = vpop.f32.mrb[43].mxu1  ;;  %v4667_v0 = vpop.f32.mrb[39].mxu0 }
0x1160   : > { %v4703_v1 = vpop.f32.mrb[44].mxu1  ;;  %v4743_v56 = vpop.f32.mrb[40].mxu0 }
0x1161   : > { %v4704_v11 = vadd.f32 %v4703_v1, %v4664_v62  ;;  %v4705_v58 = vpop.f32.mrb[45].mxu1  ;;  %v4745_v15 = vpop.f32.mrb[41].mxu0 }
0x1162   : > { %v4706_v6 = vpop.f32.mrb[46].mxu1  ;;  %v4746_v3 = vpop.f32.mrb[42].mxu0 }
0x1163   : > { %v4744_v20 = vadd.f32 %v4743_v56, %v4704_v11  ;;  %v4707_v4 = vpop.f32.mrb[47].mxu1  ;;  %v4747_v13 = vpop.f32.mrb[43].mxu0 }
0x1170   : > { %v4783_v14 = vpop.f32.mrb[48].mxu1 }
0x1171   : > { %v4784_v16 = vadd.f32 %v4783_v14, %v4744_v20  ;;  %v4823_v22 = vpop.f32.mrb[44].mxu0  ;;  %v4785_v25 = vpop.f32.mrb[49].mxu1 }
0x1172   : > { %v4825_v27 = vpop.f32.mrb[45].mxu0  ;;  %v4786_v7 = vpop.f32.mrb[50].mxu1 }
0x1173   : > { %v4824_v30 = vadd.f32 %v4823_v22, %v4784_v16  ;;  %v4826_v31 = vpop.f32.mrb[46].mxu0  ;;  %v4787_v32 = vpop.f32.mrb[51].mxu1 }
0x1174   : > { %v4827_v26 = vpop.f32.mrb[47].mxu0 }
0x1180   : > { %v4863_v33 = vpop.f32.mrb[52].mxu1 }
0x1181   : > { %v4864_v47 = vadd.f32 %v4863_v33, %v4824_v30  ;;  %v4903_v34 = vpop.f32.mrb[48].mxu0  ;;  %v4865_v36 = vpop.f32.mrb[53].mxu1 }
0x1182   : > { %v4905_v5 = vpop.f32.mrb[49].mxu0  ;;  %v4866_v29 = vpop.f32.mrb[54].mxu1 }
0x1183   : > { %v4904_v19 = vadd.f32 %v4903_v34, %v4864_v47  ;;  %v4906_v63 = vpop.f32.mrb[50].mxu0  ;;  %v4867_v2 = vpop.f32.mrb[55].mxu1 }
0x1184   : > { %v4907_v37 = vpop.f32.mrb[51].mxu0 }
0x1185   : > { %v4909_v39 = vadd.f32 %v4904_v19, %v6577_v40 }
0x1187   : > { %v4910_v18 = vsel %vm416_vm2, %v4909_v39, 0.0 }
0x1188   : > { %4911 = vadd.xlane.f32.xlu0 %v4910_v18 }
0x1215   : > { %v4912_v48 = vpop.xlane.xlu0 %4911 }
0x1216   : > { %v4913_v9 = vmul.f32 0.03125, %v4912_v48 }
0x1218   : > { %v4914_v45 = vsub.f32 %v4909_v39, %v4913_v9 }
0x121a   : > { %v4915_v28 = vmul.f32 %v4914_v45, %v4914_v45 }
0x121c   : > { %v4916_v38 = vsel %vm416_vm2, %v4915_v28, 0.0 }
0x121d   : > { %4917 = vadd.xlane.f32.xlu0 %v4916_v38 }
0x12aa   : > { %v4918_v12 = vpop.xlane.xlu0 %4917 }
0x12ab   : > { %v4919_v57 = vmul.f32 0.03125, %v4918_v12 }
0x12ad   : > { %v4920_v41 = vadd.f32 1e-05, %v4919_v57 }
0x12af   : > { %5610 = vrsqrt.f32 %v4920_v41 }
0x12b9   : > { %v5611_v49 = vpop.eup %5610 }
0x12ba   : > { %v4922_v40 = vmul.f32 %v5611_v49, %v4914_v45  ;;  %4937 = sbr.rel (%p5213_p7) target bundleno = 4801 (0x12c1), region = 68 }
0x12bc   : > { %v4927_v35 = vmul.f32 %v4926_v43, %v4922_v40 }
0x12be   : > { %v4932_v8 = vadd.f32 %v4931_v51, %v4927_v35 }
0x12c0   : > { %4933 = vst.msk [vmem:[#allocation2] sm:$0xff] %vm416_vm2, %v4932_v8  ;;  %4938 = vst.msk [vmem:[#allocation9] sm:$0xff] (!%p5213_p7), %vm416_vm2, %v4932_v8 }
0x12c1 PF: > { %p5520_p12 = scmp.eq.s32.totalorder %s5856_s28, 1  ;;  %s5796_s13 = smov [#allocation9]  }
0x12c2   : > { %s4946_s11 = sshll.u32 %s5796_s13, 4  ;;  %s4947_s11 = int_to_ptr.vmem [resolvable:$true] %s4946_s11 }
0x12c3   : > { %s5704_s14 = scalar_lea.vmem %s4947_s11, 128  ;;  %p5711_p6 = scmp.lt.s32.totalorder %s4947_s11, %s4947_s11 }
0x12c4   : > { %p5705_p2 = scmp.ne.s32.totalorder %s4947_s11, %s5704_s14  ;;  %p5712_p4 = scmp.lt.s32.totalorder %s5704_s14, %s5704_s14 }
0x12c6   : > { %p5706_p3 = pnand %p5705_p2, %p5520_p12  ;;  %p5713_p1 = por %p5712_p4, %p5711_p6 }
0x12c8   : > { %p5707_p5 = pneg %p5706_p3 }
0x12ca   : > { %p5714_p11 = pnand %p5713_p1, %p5707_p5 }
0x12cc   : > { %5717 = shalt.err (!%p5714_p11)
}
0x12cd   : > { %s5718_s30 = scalar_lea.hbm %s6750_s7, 128 }
0x12ce   : > { %p5719_p13 = scmp.ne.s32.totalorder %s6750_s7, %s5718_s30  ;;  %p5724_p8 = scmp.lt.u32.totalorder %s5718_s30, %s6750_s7 }
0x12d0   : > { %p5720_p10 = pnand %p5719_p13, %p5520_p12 }
0x12d2   : > { %p5721_p9 = pneg %p5720_p10 }
0x12d4   : > { %p5726_p0 = pnand %p5724_p8, %p5721_p9 }
0x12d6   : > { %5729 = shalt.err (!%p5726_p0)
}
0x12d7   : > { %5506 = dma.vmem_to_hbm [thread:$0]  (%p5520_p12), %s4947_s11, 128, %s6750_s7, [#allocation5]  }
0x12d8   : > { %5755 = dma.done.wait (%p5520_p12), [#allocation5], 128  }
0x12d9   : > { %5757 = vsyncadd (%p5520_p12), [#allocation5], 4294967168 }
0x12da PF: > { %p21_p7 = scmp.ge.s32.totalorder %s5859_s29, 4   ;;  %s6766_s24 = smov %s5764_s25 }
0x12db   : > { %s6767_s25 = smov %s5768_s26  ;;  %s6768_s26 = smov %s5869_s9 }
0x12dc   : > { %s6769_s27 = smov %s5859_s29  ;;  %23 = sbr.rel (!%p21_p7) target bundleno = 8 (0x8), region = 124 }
0x12e3   :  { %4959 = vsyncpa [#allocation4], 1 }
0x12e4   :  { %4961 = vsyncpa [#allocation4 + $0x1], 1 }
0x12e5   :  { %4962 = vsyncpa [#allocation7], 1 }
0x12e6   :  { %4964 = vsyncpa [#allocation7 + $0x1], 1 }
0x12e7   :  { %4965 = vsyncpa [#allocation5], 1 }
0x12e8   :  { %4967 = vsyncpa [#allocation5 + $0x1], 1 }

</bundles_post_ra>
